<compile_context>
chip_gen: v6e
topology: v6e:2x2x1
jax: 0.10.0
libtpu: 0.0.40
codegen_flags: <defaults>
</compile_context>

<pallas_src>
import functools

import jax
import jax.numpy as jnp
import numpy as np
from jax import lax
from jax.experimental import pallas as pl
from jax.experimental.pallas import tpu as pltpu

_IN_PAD = 8  # sublane-aligned zero pad for the fused input conv (k=3, pad=1)


# --------------------------------------------------------------------------- #
# Fused per-level Pallas kernel
# --------------------------------------------------------------------------- #
def _level_kernel(*refs, T, P, dilations, res_scale, has_in_conv, compute_dtype):
    """One decoder level: [conv_in] -> depth x ResConv1DBlock -> ConvT(s=2,k=4,p=1).

    refs = x, [w_in, b_in], (w3, b3, w1, b1) * depth, wt_mid, wt_left, wt_right,
           bt, out, xp_scratch, [xin_scratch]
    """
    idx = 0
    x_ref = refs[idx]; idx += 1
    if has_in_conv:
        w_in_ref, b_in_ref = refs[idx], refs[idx + 1]; idx += 2
    res_refs = []
    for _ in dilations:
        res_refs.append(refs[idx:idx + 4]); idx += 4
    wt_mid_ref, wt_left_ref, wt_right_ref, bt_ref = refs[idx:idx + 4]; idx += 4
    o_ref = refs[idx]; idx += 1
    xp_ref = refs[idx]; idx += 1                       # (T + 2P, width) f32 scratch
    if has_in_conv:
        xin_ref = refs[idx]                            # (T + 2*_IN_PAD, Cin) f32 scratch

    cd = compute_dtype

    def im2col3(h, pad, d):
        # h: (T + 2*pad, C) with zero borders; returns (T, 3C): taps t-d, t, t+d.
        return jnp.concatenate(
            [h[pad - d:pad - d + T], h[pad:pad + T], h[pad + d:pad + d + T]], axis=1)

    # Zero the padded working buffer once; border rows stay 0 == conv zero padding.
    xp_ref[...] = jnp.zeros_like(xp_ref)

    # ---- input Conv1d(k=3, s=1, p=1) (level 0 only) or pass-through ---------- #
    if has_in_conv:
        xin_ref[...] = jnp.zeros_like(xin_ref)
        xin_ref[_IN_PAD:_IN_PAD + T, :] = x_ref[0].astype(jnp.float32)
        cat_in = im2col3(xin_ref[...], _IN_PAD, 1).astype(cd)       # (T, 3*Cin)
        x0 = (jnp.dot(cat_in, w_in_ref[...], preferred_element_type=jnp.float32)
              + b_in_ref[...])
    else:
        x0 = x_ref[0].astype(jnp.float32)
    xp_ref[P:P + T, :] = x0

    # ---- ResConv1DBlocks: x += res_scale * Conv1x1(ReLU(Conv3_dil(ReLU(x)))) -- #
    for (w3_ref, b3_ref, w1_ref, b1_ref), d in zip(res_refs, dilations):
        full = xp_ref[...]                               # (T + 2P, C) f32
        center = full[P:P + T]                           # unpadded x for the residual
        h = jnp.maximum(full, 0.0)                       # pad(relu(x)): borders stay 0
        cat = im2col3(h, P, d).astype(cd)                # (T, 3C) bf16
        a = (jnp.dot(cat, w3_ref[...], preferred_element_type=jnp.float32)
             + b3_ref[...])
        a = jnp.maximum(a, 0.0).astype(cd)               # (T, S)
        y = (jnp.dot(a, w1_ref[...], preferred_element_type=jnp.float32)
             + b1_ref[...])                              # (T, C) f32
        if res_scale != 1.0:
            y = res_scale * y
        xp_ref[P:P + T, :] = center + y

    # ---- ConvTranspose1d(stride=2, kernel=4, pad=1) --------------------------- #
    #   y[2j]   = x[j] @ W[:,:,1] + x[j-1] @ W[:,:,3] + b   (even phase)
    #   y[2j+1] = x[j] @ W[:,:,2] + x[j+1] @ W[:,:,0] + b   (odd  phase)
    full = xp_ref[...]
    x_prev = full[P - 1:P - 1 + T].astype(cd)            # x[j-1] (zero at j=0)
    x_mid = full[P:P + T].astype(cd)                     # x[j]
    x_next = full[P + 1:P + 1 + T].astype(cd)            # x[j+1] (zero at j=T-1)
    mid = jnp.dot(x_mid, wt_mid_ref[...],
                  preferred_element_type=jnp.float32)    # (T, 2*Cout): even | odd
    left = (jnp.dot(x_prev, wt_left_ref[...], preferred_element_type=jnp.float32)
            + bt_ref[...])                               # even-phase edge tap
    right = (jnp.dot(x_next, wt_right_ref[...], preferred_element_type=jnp.float32)
             + bt_ref[...])                              # odd-phase edge tap
    out = mid + jnp.concatenate([left, right], axis=1)   # (T, 2*Cout)
    # Columns [:Cout] = y[2j], [Cout:] = y[2j+1]; host reshape interleaves for free.
    o_ref[0] = out.astype(o_ref.dtype)


# --------------------------------------------------------------------------- #
# Wrappers: weight packing (once) + pallas_call plumbing per level
# --------------------------------------------------------------------------- #
def pack_params(params, cfg, compute_dtype=jnp.bfloat16):
    """Pre-pack PyTorch-layout weights into kernel layouts (transpose/concat/bf16)."""
    width = cfg["width"]
    levels = []
    for li, blk in enumerate(params["blocks"]):
        lvl = {"res": [], "dilations": []}
        if li == 0:
            w_in = params["conv_in"]["w"]                # (width, Cin, 3) PyTorch OIW
            cin = w_in.shape[1]
            lvl["w_in"] = (jnp.transpose(w_in, (2, 1, 0))
                           .reshape(3 * cin, width).astype(compute_dtype))
            lvl["b_in"] = params["conv_in"]["b"].reshape(1, width).astype(jnp.float32)
        for rb in blk["res"]:
            S = rb["w3"].shape[0]
            lvl["res"].append({
                "w3": (jnp.transpose(rb["w3"], (2, 1, 0))          # (3, C, S) -> (3C, S)
                       .reshape(3 * width, S).astype(compute_dtype)),
                "b3": rb["b3"].reshape(1, S).astype(jnp.float32),
                "w1": jnp.transpose(rb["w1"][:, :, 0], (1, 0)).astype(compute_dtype),
                "b1": rb["b1"].reshape(1, width).astype(jnp.float32),
            })
            lvl["dilations"].append(int(rb["dilation"]))
        wt = blk["wt"]                                   # (width, Cout, 4) PyTorch IOW
        cout = wt.shape[1]
        wk = jnp.transpose(wt, (2, 0, 1))                # (4, width, Cout)
        lvl["wt_mid"] = jnp.concatenate([wk[1], wk[2]], axis=1).astype(compute_dtype)
        lvl["wt_left"] = wk[3].astype(compute_dtype)     # pairs with x[j-1] (even phase)
        lvl["wt_right"] = wk[0].astype(compute_dtype)    # pairs with x[j+1] (odd phase)
        lvl["bt"] = blk["bt"].reshape(1, cout).astype(jnp.float32)
        levels.append(lvl)
    return {"levels": levels}


def _run_level(x, lvl, *, width, res_scale, has_in_conv, compute_dtype, out_dtype):
    B, T, Cin = x.shape
    dilations = tuple(lvl["dilations"])
    maxd = max(dilations) if dilations else 1
    P = ((max(maxd, 1) + 7) // 8) * 8                    # sublane-aligned interior offset
    Cout = lvl["wt_left"].shape[1]

    def const_spec(arr):
        return pl.BlockSpec(arr.shape, lambda b, _nd=arr.ndim: (0,) * _nd)

    inputs = [x]
    in_specs = [pl.BlockSpec((1, T, Cin), lambda b: (b, 0, 0))]
    if has_in_conv:
        inputs += [lvl["w_in"], lvl["b_in"]]
        in_specs += [const_spec(lvl["w_in"]), const_spec(lvl["b_in"])]
    for rb in lvl["res"]:
        ws = (rb["w3"], rb["b3"], rb["w1"], rb["b1"])
        inputs += list(ws)
        in_specs += [const_spec(a) for a in ws]
    tail = (lvl["wt_mid"], lvl["wt_left"], lvl["wt_right"], lvl["bt"])
    inputs += list(tail)
    in_specs += [const_spec(a) for a in tail]

    scratch = [pltpu.VMEM((T + 2 * P, width), jnp.float32)]
    if has_in_conv:
        scratch.append(pltpu.VMEM((T + 2 * _IN_PAD, Cin), jnp.float32))

    kern = functools.partial(
        _level_kernel, T=T, P=P, dilations=dilations, res_scale=float(res_scale),
        has_in_conv=has_in_conv, compute_dtype=compute_dtype)

    y = pl.pallas_call(
        kern,
        out_shape=jax.ShapeDtypeStruct((B, T, 2 * Cout), out_dtype),
        grid=(B,),
        in_specs=in_specs,
        out_specs=pl.BlockSpec((1, T, 2 * Cout), lambda b: (b, 0, 0)),
        scratch_shapes=scratch,
        compiler_params=pltpu.CompilerParams(
            dimension_semantics=("parallel",),
            vmem_limit_bytes=48 * 1024 * 1024),
    )(*inputs)
    # (B, T, 2*Cout) -> (B, 2T, Cout): pure row-major reshape (no data movement).
    return y.reshape(B, 2 * T, Cout)


def decoder_conv_block_forward(x_ncw, packed, cfg, compute_dtype=jnp.bfloat16):
    """Full DecoderConvBlock forward. x_ncw: (B, output_emb_width, T) PyTorch NCW."""
    x = jnp.transpose(x_ncw, (0, 2, 1)).astype(jnp.float32)      # NCW -> (B, T, C)
    n_levels = len(packed["levels"])
    for li, lvl in enumerate(packed["levels"]):
        last = li == n_levels - 1
        x = _run_level(
            x, lvl, width=cfg["width"], res_scale=cfg["res_scale_val"],
            has_in_conv=(li == 0), compute_dtype=compute_dtype,
            out_dtype=jnp.float32 if last else compute_dtype)
    return jnp.transpose(x, (0, 2, 1))                            # back to NCW


# --------------------------------------------------------------------------- #
# Deterministic parameter init (PyTorch layouts)
# --------------------------------------------------------------------------- #
def init_params(key, cfg):
    width = cfg["width"]
    n_state = int(cfg["m_conv"] * width)
    keys = iter(jax.random.split(key, 128))

    def nrm(shape, scale=0.1):
        return scale * jax.random.normal(next(keys), shape, dtype=jnp.float32)

    params = {
        "conv_in": {"w": nrm((width, cfg["output_emb_width"], 3)), "b": nrm((width,))},
        "blocks": [],
    }
    for i in range(cfg["down_t"]):
        out_ch = cfg["input_emb_width"] if i == cfg["down_t"] - 1 else width
        res = []
        for dpt in range(cfg["depth"]):
            dil = cfg["dilation_growth_rate"] ** dpt     # dilation_cycle=None
            res.append({"w3": nrm((n_state, width, 3)), "b3": nrm((n_state,)),
                        "w1": nrm((width, n_state, 1)), "b1": nrm((width,)),
                        "dilation": dil})
        params["blocks"].append({"res": res,
                                 "wt": nrm((width, out_ch, cfg["stride_t"] * 2)),
                                 "bt": nrm((out_ch,))})
    return params


# --------------------------------------------------------------------------- #
# Pure-JAX (lax.conv, f32) reference for correctness
# --------------------------------------------------------------------------- #
_DN = ("NCH", "OIH", "NCH")


def _ref_conv1d(x, w, b, dilation=1, padding=0):
    y = lax.conv_general_dilated(x, w, window_strides=(1,), padding=[(padding, padding)],
                                 rhs_dilation=(dilation,), dimension_numbers=_DN,
                                 precision=lax.Precision.HIGHEST)
    return y + b[None, :, None]


def _ref_conv_transpose1d(x, w, b, stride, padding):
    K = w.shape[-1]
    w_conv = jnp.flip(jnp.transpose(w, (1, 0, 2)), axis=-1)      # (Cout, Cin, K)
    y = lax.conv_general_dilated(x, w_conv, window_strides=(1,),
                                 padding=[(K - 1 - padding, K - 1 - padding)],
                                 lhs_dilation=(stride,), dimension_numbers=_DN,
                                 precision=lax.Precision.HIGHEST)
    return y + b[None, :, None]


def ref_forward(x, params, cfg):
    x = _ref_conv1d(x, params["conv_in"]["w"], params["conv_in"]["b"], dilation=1, padding=1)
    for blk in params["blocks"]:
        for rb in blk["res"]:
            h = jax.nn.relu(x)
            h = _ref_conv1d(h, rb["w3"], rb["b3"], dilation=rb["dilation"], padding=rb["dilation"])
            h = jax.nn.relu(h)
            h = _ref_conv1d(h, rb["w1"], rb["b1"], dilation=1, padding=0)
            x = x + cfg["res_scale_val"] * h
        x = _ref_conv_transpose1d(x, blk["wt"], blk["bt"],
                                  stride=cfg["stride_t"], padding=cfg["stride_t"] // 2)
    return x


# --------------------------------------------------------------------------- #
if __name__ == "__main__":
    cfg = dict(input_emb_width=4, output_emb_width=8, down_t=2, stride_t=2,
               width=32, depth=2, m_conv=1.0, dilation_growth_rate=2,
               res_scale=False)
    # res_scale=False -> 1.0 (Jukebox uses 1/sqrt(depth) when True)
    cfg["res_scale_val"] = 1.0 if not cfg["res_scale"] else 1.0 / np.sqrt(cfg["depth"])
    assert cfg["stride_t"] == 2, "transposed-conv kernel specialized for stride_t=2"

    key = jax.random.PRNGKey(0)
    k_x, k_p = jax.random.split(key)
    B, T = 2, 16
    x = jax.random.normal(k_x, (B, cfg["output_emb_width"], T), dtype=jnp.float32)
    params = init_params(k_p, cfg)
    packed = pack_params(params, cfg)                 # one-time weight repack + bf16 cast

    fwd = jax.jit(lambda xin: decoder_conv_block_forward(xin, packed, cfg))
    out = jax.block_until_ready(fwd(x))

    T_out = T * cfg["stride_t"] ** cfg["down_t"]
    assert out.shape == (B, cfg["input_emb_width"], T_out), out.shape

    ref = ref_forward(x, params, cfg)
    # bf16 MXU inputs (f32 accumulation) vs f32 lax.conv reference -> loose tolerance.
    np.testing.assert_allclose(np.asarray(out), np.asarray(ref), rtol=1e-1, atol=5e-2)

    print("KERNEL_OK")
</pallas_src>

<mosaic_0001>
module attributes {stable_mosaic.version = 11 : i64} {
  func.func @_level_kernel(%arg0: i32, %arg1: memref<1x32x32xbf16, #tpu.memory_space<vmem>>, %arg2: memref<96x32xbf16, #tpu.memory_space<vmem>>, %arg3: memref<1x32xf32, #tpu.memory_space<vmem>>, %arg4: memref<32x32xbf16, #tpu.memory_space<vmem>>, %arg5: memref<1x32xf32, #tpu.memory_space<vmem>>, %arg6: memref<96x32xbf16, #tpu.memory_space<vmem>>, %arg7: memref<1x32xf32, #tpu.memory_space<vmem>>, %arg8: memref<32x32xbf16, #tpu.memory_space<vmem>>, %arg9: memref<1x32xf32, #tpu.memory_space<vmem>>, %arg10: memref<32x8xbf16, #tpu.memory_space<vmem>>, %arg11: memref<32x4xbf16, #tpu.memory_space<vmem>>, %arg12: memref<32x4xbf16, #tpu.memory_space<vmem>>, %arg13: memref<1x4xf32, #tpu.memory_space<vmem>>, %arg14: memref<1x32x8xf32, #tpu.memory_space<vmem>>, %arg15: memref<48x32xf32, #tpu.memory_space<vmem>>) attributes {dimension_semantics = [#tpu.dimension_semantics<parallel>], iteration_bounds = array<i64: 2>, scalar_prefetch = 0 : i64, scratch_operands = 1 : i64, tpu.core_type = #tpu.core_type<tc>, window_params = [{transform_indices = @transform_0, window_bounds = array<i64: 1, 32, 32>}, {pipeline_mode = #tpu.pipeline_mode<synchronous>, transform_indices = @transform_1, window_bounds = array<i64: 96, 32>}, {pipeline_mode = #tpu.pipeline_mode<synchronous>, transform_indices = @transform_2, window_bounds = array<i64: 1, 32>}, {pipeline_mode = #tpu.pipeline_mode<synchronous>, transform_indices = @transform_3, window_bounds = array<i64: 32, 32>}, {pipeline_mode = #tpu.pipeline_mode<synchronous>, transform_indices = @transform_4, window_bounds = array<i64: 1, 32>}, {pipeline_mode = #tpu.pipeline_mode<synchronous>, transform_indices = @transform_5, window_bounds = array<i64: 96, 32>}, {pipeline_mode = #tpu.pipeline_mode<synchronous>, transform_indices = @transform_6, window_bounds = array<i64: 1, 32>}, {pipeline_mode = #tpu.pipeline_mode<synchronous>, transform_indices = @transform_7, window_bounds = array<i64: 32, 32>}, {pipeline_mode = #tpu.pipeline_mode<synchronous>, transform_indices = @transform_8, window_bounds = array<i64: 1, 32>}, {pipeline_mode = #tpu.pipeline_mode<synchronous>, transform_indices = @transform_9, window_bounds = array<i64: 32, 8>}, {pipeline_mode = #tpu.pipeline_mode<synchronous>, transform_indices = @transform_10, window_bounds = array<i64: 32, 4>}, {pipeline_mode = #tpu.pipeline_mode<synchronous>, transform_indices = @transform_11, window_bounds = array<i64: 32, 4>}, {pipeline_mode = #tpu.pipeline_mode<synchronous>, transform_indices = @transform_12, window_bounds = array<i64: 1, 4>}, {transform_indices = @transform_13, window_bounds = array<i64: 1, 32, 8>}]} {
    %cst = arith.constant 0.000000e+00 : f32
    %0 = vector.broadcast %cst : f32 to vector<48x32xf32>
    %c0 = arith.constant 0 : index
    %c0_0 = arith.constant 0 : index
    %1 = vector.load %arg15[%c0, %c0_0] : memref<48x32xf32, #tpu.memory_space<vmem>>, vector<48x32xf32>
    tpu.vector_store %arg15[%c0, %c0_0], %0 {strides = array<i32>} : memref<48x32xf32, #tpu.memory_space<vmem>>, vector<48x32xf32>,
    %c0_1 = arith.constant 0 : index
    %c0_2 = arith.constant 0 : index
    %c0_3 = arith.constant 0 : index
    %2 = vector.load %arg1[%c0_1, %c0_2, %c0_3] : memref<1x32x32xbf16, #tpu.memory_space<vmem>>, vector<1x32x32xbf16>
    %3 = vector.shape_cast %2 : vector<1x32x32xbf16> to vector<32x32xbf16>
    %4 = arith.extf %3 : vector<32x32xbf16> to vector<32x32xf32>
    %c8 = arith.constant 8 : index
    %c0_4 = arith.constant 0 : index
    %5 = vector.load %arg15[%c8, %c0_4] : memref<48x32xf32, #tpu.memory_space<vmem>>, vector<32x32xf32>
    tpu.vector_store %arg15[%c8, %c0_4], %4 {strides = array<i32>} : memref<48x32xf32, #tpu.memory_space<vmem>>, vector<32x32xf32>,
    %c0_5 = arith.constant 0 : index
    %c0_6 = arith.constant 0 : index
    %6 = vector.load %arg15[%c0_5, %c0_6] : memref<48x32xf32, #tpu.memory_space<vmem>>, vector<48x32xf32>
    %7 = vector.extract_strided_slice %6 {offsets = [8, 0], sizes = [32, 32], strides = [1, 1]} : vector<48x32xf32> to vector<32x32xf32>
    %cst_7 = arith.constant 0.000000e+00 : f32
    %8 = vector.broadcast %cst_7 : f32 to vector<48x32xf32>
    %9 = arith.maximumf %6, %8 : vector<48x32xf32>
    %10 = vector.extract_strided_slice %9 {offsets = [7, 0], sizes = [32, 32], strides = [1, 1]} : vector<48x32xf32> to vector<32x32xf32>
    %11 = vector.extract_strided_slice %9 {offsets = [8, 0], sizes = [32, 32], strides = [1, 1]} : vector<48x32xf32> to vector<32x32xf32>
    %12 = vector.extract_strided_slice %9 {offsets = [9, 0], sizes = [32, 32], strides = [1, 1]} : vector<48x32xf32> to vector<32x32xf32>
    %13 = tpu.concatenate %10, %11, %12 in 1 : vector<32x32xf32>, vector<32x32xf32>, vector<32x32xf32> -> vector<32x96xf32>
    %14 = arith.truncf %13 : vector<32x96xf32> to vector<32x96xbf16>
    %c0_8 = arith.constant 0 : index
    %c0_9 = arith.constant 0 : index
    %15 = vector.load %arg2[%c0_8, %c0_9] : memref<96x32xbf16, #tpu.memory_space<vmem>>, vector<96x32xbf16>
    %cst_10 = arith.constant dense<0.000000e+00> : vector<32x32xf32>
    %16 = tpu.matmul %14, %15, %cst_10 {dimension_numbers = #tpu.dot_dimension_numbers<[1], [0], [0], [1], [0, 0, 1, 1], [], []>} : vector<32x96xbf16>, vector<96x32xbf16>, vector<32x32xf32> -> vector<32x32xf32>
    %c0_11 = arith.constant 0 : index
    %c0_12 = arith.constant 0 : index
    %17 = vector.load %arg3[%c0_11, %c0_12] : memref<1x32xf32, #tpu.memory_space<vmem>>, vector<1x32xf32>
    %18 = vector.broadcast %17 : vector<1x32xf32> to vector<32x32xf32>
    %19 = arith.addf %16, %18 : vector<32x32xf32>
    %cst_13 = arith.constant 0.000000e+00 : f32
    %20 = vector.broadcast %cst_13 : f32 to vector<32x32xf32>
    %21 = arith.maximumf %19, %20 : vector<32x32xf32>
    %22 = arith.truncf %21 : vector<32x32xf32> to vector<32x32xbf16>
    %c0_14 = arith.constant 0 : index
    %c0_15 = arith.constant 0 : index
    %23 = vector.load %arg4[%c0_14, %c0_15] : memref<32x32xbf16, #tpu.memory_space<vmem>>, vector<32x32xbf16>
    %cst_16 = arith.constant dense<0.000000e+00> : vector<32x32xf32>
    %24 = tpu.matmul %22, %23, %cst_16 {dimension_numbers = #tpu.dot_dimension_numbers<[1], [0], [0], [1], [0, 0, 1, 1], [], []>} : vector<32x32xbf16>, vector<32x32xbf16>, vector<32x32xf32> -> vector<32x32xf32>
    %c0_17 = arith.constant 0 : index
    %c0_18 = arith.constant 0 : index
    %25 = vector.load %arg5[%c0_17, %c0_18] : memref<1x32xf32, #tpu.memory_space<vmem>>, vector<1x32xf32>
    %26 = vector.broadcast %25 : vector<1x32xf32> to vector<32x32xf32>
    %27 = arith.addf %24, %26 : vector<32x32xf32>
    %28 = arith.addf %7, %27 : vector<32x32xf32>
    %c8_19 = arith.constant 8 : index
    %c0_20 = arith.constant 0 : index
    %29 = vector.load %arg15[%c8_19, %c0_20] : memref<48x32xf32, #tpu.memory_space<vmem>>, vector<32x32xf32>
    tpu.vector_store %arg15[%c8_19, %c0_20], %28 {strides = array<i32>} : memref<48x32xf32, #tpu.memory_space<vmem>>, vector<32x32xf32>,
    %c0_21 = arith.constant 0 : index
    %c0_22 = arith.constant 0 : index
    %30 = vector.load %arg15[%c0_21, %c0_22] : memref<48x32xf32, #tpu.memory_space<vmem>>, vector<48x32xf32>
    %31 = vector.extract_strided_slice %30 {offsets = [8, 0], sizes = [32, 32], strides = [1, 1]} : vector<48x32xf32> to vector<32x32xf32>
    %cst_23 = arith.constant 0.000000e+00 : f32
    %32 = vector.broadcast %cst_23 : f32 to vector<48x32xf32>
    %33 = arith.maximumf %30, %32 : vector<48x32xf32>
    %34 = vector.extract_strided_slice %33 {offsets = [6, 0], sizes = [32, 32], strides = [1, 1]} : vector<48x32xf32> to vector<32x32xf32>
    %35 = vector.extract_strided_slice %33 {offsets = [8, 0], sizes = [32, 32], strides = [1, 1]} : vector<48x32xf32> to vector<32x32xf32>
    %36 = vector.extract_strided_slice %33 {offsets = [10, 0], sizes = [32, 32], strides = [1, 1]} : vector<48x32xf32> to vector<32x32xf32>
    %37 = tpu.concatenate %34, %35, %36 in 1 : vector<32x32xf32>, vector<32x32xf32>, vector<32x32xf32> -> vector<32x96xf32>
    %38 = arith.truncf %37 : vector<32x96xf32> to vector<32x96xbf16>
    %c0_24 = arith.constant 0 : index
    %c0_25 = arith.constant 0 : index
    %39 = vector.load %arg6[%c0_24, %c0_25] : memref<96x32xbf16, #tpu.memory_space<vmem>>, vector<96x32xbf16>
    %cst_26 = arith.constant dense<0.000000e+00> : vector<32x32xf32>
    %40 = tpu.matmul %38, %39, %cst_26 {dimension_numbers = #tpu.dot_dimension_numbers<[1], [0], [0], [1], [0, 0, 1, 1], [], []>} : vector<32x96xbf16>, vector<96x32xbf16>, vector<32x32xf32> -> vector<32x32xf32>
    %c0_27 = arith.constant 0 : index
    %c0_28 = arith.constant 0 : index
    %41 = vector.load %arg7[%c0_27, %c0_28] : memref<1x32xf32, #tpu.memory_space<vmem>>, vector<1x32xf32>
    %42 = vector.broadcast %41 : vector<1x32xf32> to vector<32x32xf32>
    %43 = arith.addf %40, %42 : vector<32x32xf32>
    %cst_29 = arith.constant 0.000000e+00 : f32
    %44 = vector.broadcast %cst_29 : f32 to vector<32x32xf32>
    %45 = arith.maximumf %43, %44 : vector<32x32xf32>
    %46 = arith.truncf %45 : vector<32x32xf32> to vector<32x32xbf16>
    %c0_30 = arith.constant 0 : index
    %c0_31 = arith.constant 0 : index
    %47 = vector.load %arg8[%c0_30, %c0_31] : memref<32x32xbf16, #tpu.memory_space<vmem>>, vector<32x32xbf16>
    %cst_32 = arith.constant dense<0.000000e+00> : vector<32x32xf32>
    %48 = tpu.matmul %46, %47, %cst_32 {dimension_numbers = #tpu.dot_dimension_numbers<[1], [0], [0], [1], [0, 0, 1, 1], [], []>} : vector<32x32xbf16>, vector<32x32xbf16>, vector<32x32xf32> -> vector<32x32xf32>
    %c0_33 = arith.constant 0 : index
    %c0_34 = arith.constant 0 : index
    %49 = vector.load %arg9[%c0_33, %c0_34] : memref<1x32xf32, #tpu.memory_space<vmem>>, vector<1x32xf32>
    %50 = vector.broadcast %49 : vector<1x32xf32> to vector<32x32xf32>
    %51 = arith.addf %48, %50 : vector<32x32xf32>
    %52 = arith.addf %31, %51 : vector<32x32xf32>
    %c8_35 = arith.constant 8 : index
    %c0_36 = arith.constant 0 : index
    %53 = vector.load %arg15[%c8_35, %c0_36] : memref<48x32xf32, #tpu.memory_space<vmem>>, vector<32x32xf32>
    tpu.vector_store %arg15[%c8_35, %c0_36], %52 {strides = array<i32>} : memref<48x32xf32, #tpu.memory_space<vmem>>, vector<32x32xf32>,
    %c0_37 = arith.constant 0 : index
    %c0_38 = arith.constant 0 : index
    %54 = vector.load %arg15[%c0_37, %c0_38] : memref<48x32xf32, #tpu.memory_space<vmem>>, vector<48x32xf32>
    %55 = vector.extract_strided_slice %54 {offsets = [7, 0], sizes = [32, 32], strides = [1, 1]} : vector<48x32xf32> to vector<32x32xf32>
    %56 = arith.truncf %55 : vector<32x32xf32> to vector<32x32xbf16>
    %57 = vector.extract_strided_slice %54 {offsets = [8, 0], sizes = [32, 32], strides = [1, 1]} : vector<48x32xf32> to vector<32x32xf32>
    %58 = arith.truncf %57 : vector<32x32xf32> to vector<32x32xbf16>
    %59 = vector.extract_strided_slice %54 {offsets = [9, 0], sizes = [32, 32], strides = [1, 1]} : vector<48x32xf32> to vector<32x32xf32>
    %60 = arith.truncf %59 : vector<32x32xf32> to vector<32x32xbf16>
    %c0_39 = arith.constant 0 : index
    %c0_40 = arith.constant 0 : index
    %61 = vector.load %arg10[%c0_39, %c0_40] : memref<32x8xbf16, #tpu.memory_space<vmem>>, vector<32x8xbf16>
    %cst_41 = arith.constant dense<0.000000e+00> : vector<32x8xf32>
    %62 = tpu.matmul %58, %61, %cst_41 {dimension_numbers = #tpu.dot_dimension_numbers<[1], [0], [0], [1], [0, 0, 1, 1], [], []>} : vector<32x32xbf16>, vector<32x8xbf16>, vector<32x8xf32> -> vector<32x8xf32>
    %c0_42 = arith.constant 0 : index
    %c0_43 = arith.constant 0 : index
    %63 = vector.load %arg11[%c0_42, %c0_43] : memref<32x4xbf16, #tpu.memory_space<vmem>>, vector<32x4xbf16>
    %cst_44 = arith.constant dense<0.000000e+00> : vector<32x4xf32>
    %64 = tpu.matmul %56, %63, %cst_44 {dimension_numbers = #tpu.dot_dimension_numbers<[1], [0], [0], [1], [0, 0, 1, 1], [], []>} : vector<32x32xbf16>, vector<32x4xbf16>, vector<32x4xf32> -> vector<32x4xf32>
    %c0_45 = arith.constant 0 : index
    %c0_46 = arith.constant 0 : index
    %65 = vector.load %arg13[%c0_45, %c0_46] : memref<1x4xf32, #tpu.memory_space<vmem>>, vector<1x4xf32>
    %66 = vector.broadcast %65 : vector<1x4xf32> to vector<32x4xf32>
    %67 = arith.addf %64, %66 : vector<32x4xf32>
    %c0_47 = arith.constant 0 : index
    %c0_48 = arith.constant 0 : index
    %68 = vector.load %arg12[%c0_47, %c0_48] : memref<32x4xbf16, #tpu.memory_space<vmem>>, vector<32x4xbf16>
    %cst_49 = arith.constant dense<0.000000e+00> : vector<32x4xf32>
    %69 = tpu.matmul %60, %68, %cst_49 {dimension_numbers = #tpu.dot_dimension_numbers<[1], [0], [0], [1], [0, 0, 1, 1], [], []>} : vector<32x32xbf16>, vector<32x4xbf16>, vector<32x4xf32> -> vector<32x4xf32>
    %c0_50 = arith.constant 0 : index
    %c0_51 = arith.constant 0 : index
    %70 = vector.load %arg13[%c0_50, %c0_51] : memref<1x4xf32, #tpu.memory_space<vmem>>, vector<1x4xf32>
    %71 = vector.broadcast %70 : vector<1x4xf32> to vector<32x4xf32>
    %72 = arith.addf %69, %71 : vector<32x4xf32>
    %73 = tpu.concatenate %67, %72 in 1 : vector<32x4xf32>, vector<32x4xf32> -> vector<32x8xf32>
    %74 = arith.addf %62, %73 : vector<32x8xf32>
    %c0_52 = arith.constant 0 : index
    %c0_53 = arith.constant 0 : index
    %c0_54 = arith.constant 0 : index
    %75 = vector.load %arg14[%c0_52, %c0_53, %c0_54] : memref<1x32x8xf32, #tpu.memory_space<vmem>>, vector<1x32x8xf32>
    %76 = vector.shape_cast %75 : vector<1x32x8xf32> to vector<32x8xf32>
    %77 = vector.shape_cast %74 : vector<32x8xf32> to vector<1x32x8xf32>
    tpu.vector_store %arg14[%c0_52, %c0_53, %c0_54], %77 {strides = array<i32>} : memref<1x32x8xf32, #tpu.memory_space<vmem>>, vector<1x32x8xf32>,
    return
  }
  func.func @transform_0(%arg0: i32) -> (i32, i32, i32) {
    %c0_i32 = arith.constant 0 : i32
    %c0_i32_0 = arith.constant 0 : i32
    %c0_i32_1 = arith.constant 0 : i32
    return %arg0, %c0_i32, %c0_i32_0 : i32, i32, i32
  }
  func.func @transform_1(%arg0: i32) -> (i32, i32) {
    %c0_i32 = arith.constant 0 : i32
    %c0_i32_0 = arith.constant 0 : i32
    %c0_i32_1 = arith.constant 0 : i32
    return %c0_i32, %c0_i32_0 : i32, i32
  }
  func.func @transform_2(%arg0: i32) -> (i32, i32) {
    %c0_i32 = arith.constant 0 : i32
    %c0_i32_0 = arith.constant 0 : i32
    %c0_i32_1 = arith.constant 0 : i32
    return %c0_i32, %c0_i32_0 : i32, i32
  }
  func.func @transform_3(%arg0: i32) -> (i32, i32) {
    %c0_i32 = arith.constant 0 : i32
    %c0_i32_0 = arith.constant 0 : i32
    %c0_i32_1 = arith.constant 0 : i32
    return %c0_i32, %c0_i32_0 : i32, i32
  }
  func.func @transform_4(%arg0: i32) -> (i32, i32) {
    %c0_i32 = arith.constant 0 : i32
    %c0_i32_0 = arith.constant 0 : i32
    %c0_i32_1 = arith.constant 0 : i32
    return %c0_i32, %c0_i32_0 : i32, i32
  }
  func.func @transform_5(%arg0: i32) -> (i32, i32) {
    %c0_i32 = arith.constant 0 : i32
    %c0_i32_0 = arith.constant 0 : i32
    %c0_i32_1 = arith.constant 0 : i32
    return %c0_i32, %c0_i32_0 : i32, i32
  }
  func.func @transform_6(%arg0: i32) -> (i32, i32) {
    %c0_i32 = arith.constant 0 : i32
    %c0_i32_0 = arith.constant 0 : i32
    %c0_i32_1 = arith.constant 0 : i32
    return %c0_i32, %c0_i32_0 : i32, i32
  }
  func.func @transform_7(%arg0: i32) -> (i32, i32) {
    %c0_i32 = arith.constant 0 : i32
    %c0_i32_0 = arith.constant 0 : i32
    %c0_i32_1 = arith.constant 0 : i32
    return %c0_i32, %c0_i32_0 : i32, i32
  }
  func.func @transform_8(%arg0: i32) -> (i32, i32) {
    %c0_i32 = arith.constant 0 : i32
    %c0_i32_0 = arith.constant 0 : i32
    %c0_i32_1 = arith.constant 0 : i32
    return %c0_i32, %c0_i32_0 : i32, i32
  }
  func.func @transform_9(%arg0: i32) -> (i32, i32) {
    %c0_i32 = arith.constant 0 : i32
    %c0_i32_0 = arith.constant 0 : i32
    %c0_i32_1 = arith.constant 0 : i32
    return %c0_i32, %c0_i32_0 : i32, i32
  }
  func.func @transform_10(%arg0: i32) -> (i32, i32) {
    %c0_i32 = arith.constant 0 : i32
    %c0_i32_0 = arith.constant 0 : i32
    %c0_i32_1 = arith.constant 0 : i32
    return %c0_i32, %c0_i32_0 : i32, i32
  }
  func.func @transform_11(%arg0: i32) -> (i32, i32) {
    %c0_i32 = arith.constant 0 : i32
    %c0_i32_0 = arith.constant 0 : i32
    %c0_i32_1 = arith.constant 0 : i32
    return %c0_i32, %c0_i32_0 : i32, i32
  }
  func.func @transform_12(%arg0: i32) -> (i32, i32) {
    %c0_i32 = arith.constant 0 : i32
    %c0_i32_0 = arith.constant 0 : i32
    %c0_i32_1 = arith.constant 0 : i32
    return %c0_i32, %c0_i32_0 : i32, i32
  }
  func.func @transform_13(%arg0: i32) -> (i32, i32, i32) {
    %c0_i32 = arith.constant 0 : i32
    %c0_i32_0 = arith.constant 0 : i32
    %c0_i32_1 = arith.constant 0 : i32
    return %arg0, %c0_i32, %c0_i32_0 : i32, i32, i32
  }
}

module attributes {stable_mosaic.version = 11 : i64} {
  func.func @_level_kernel(%arg0: i32, %arg1: memref<1x16x8xf32, #tpu.memory_space<vmem>>, %arg2: memref<24x32xbf16, #tpu.memory_space<vmem>>, %arg3: memref<1x32xf32, #tpu.memory_space<vmem>>, %arg4: memref<96x32xbf16, #tpu.memory_space<vmem>>, %arg5: memref<1x32xf32, #tpu.memory_space<vmem>>, %arg6: memref<32x32xbf16, #tpu.memory_space<vmem>>, %arg7: memref<1x32xf32, #tpu.memory_space<vmem>>, %arg8: memref<96x32xbf16, #tpu.memory_space<vmem>>, %arg9: memref<1x32xf32, #tpu.memory_space<vmem>>, %arg10: memref<32x32xbf16, #tpu.memory_space<vmem>>, %arg11: memref<1x32xf32, #tpu.memory_space<vmem>>, %arg12: memref<32x64xbf16, #tpu.memory_space<vmem>>, %arg13: memref<32x32xbf16, #tpu.memory_space<vmem>>, %arg14: memref<32x32xbf16, #tpu.memory_space<vmem>>, %arg15: memref<1x32xf32, #tpu.memory_space<vmem>>, %arg16: memref<1x16x64xbf16, #tpu.memory_space<vmem>>, %arg17: memref<32x32xf32, #tpu.memory_space<vmem>>, %arg18: memref<32x8xf32, #tpu.memory_space<vmem>>) attributes {dimension_semantics = [#tpu.dimension_semantics<parallel>], iteration_bounds = array<i64: 2>, scalar_prefetch = 0 : i64, scratch_operands = 2 : i64, tpu.core_type = #tpu.core_type<tc>, window_params = [{transform_indices = @transform_0, window_bounds = array<i64: 1, 16, 8>}, {pipeline_mode = #tpu.pipeline_mode<synchronous>, transform_indices = @transform_1, window_bounds = array<i64: 24, 32>}, {pipeline_mode = #tpu.pipeline_mode<synchronous>, transform_indices = @transform_2, window_bounds = array<i64: 1, 32>}, {pipeline_mode = #tpu.pipeline_mode<synchronous>, transform_indices = @transform_3, window_bounds = array<i64: 96, 32>}, {pipeline_mode = #tpu.pipeline_mode<synchronous>, transform_indices = @transform_4, window_bounds = array<i64: 1, 32>}, {pipeline_mode = #tpu.pipeline_mode<synchronous>, transform_indices = @transform_5, window_bounds = array<i64: 32, 32>}, {pipeline_mode = #tpu.pipeline_mode<synchronous>, transform_indices = @transform_6, window_bounds = array<i64: 1, 32>}, {pipeline_mode = #tpu.pipeline_mode<synchronous>, transform_indices = @transform_7, window_bounds = array<i64: 96, 32>}, {pipeline_mode = #tpu.pipeline_mode<synchronous>, transform_indices = @transform_8, window_bounds = array<i64: 1, 32>}, {pipeline_mode = #tpu.pipeline_mode<synchronous>, transform_indices = @transform_9, window_bounds = array<i64: 32, 32>}, {pipeline_mode = #tpu.pipeline_mode<synchronous>, transform_indices = @transform_10, window_bounds = array<i64: 1, 32>}, {pipeline_mode = #tpu.pipeline_mode<synchronous>, transform_indices = @transform_11, window_bounds = array<i64: 32, 64>}, {pipeline_mode = #tpu.pipeline_mode<synchronous>, transform_indices = @transform_12, window_bounds = array<i64: 32, 32>}, {pipeline_mode = #tpu.pipeline_mode<synchronous>, transform_indices = @transform_13, window_bounds = array<i64: 32, 32>}, {pipeline_mode = #tpu.pipeline_mode<synchronous>, transform_indices = @transform_14, window_bounds = array<i64: 1, 32>}, {transform_indices = @transform_15, window_bounds = array<i64: 1, 16, 64>}]} {
    %cst = arith.constant 0.000000e+00 : f32
    %0 = vector.broadcast %cst : f32 to vector<32x32xf32>
    %c0 = arith.constant 0 : index
    %c0_0 = arith.constant 0 : index
    %1 = vector.load %arg17[%c0, %c0_0] : memref<32x32xf32, #tpu.memory_space<vmem>>, vector<32x32xf32>
    tpu.vector_store %arg17[%c0, %c0_0], %0 {strides = array<i32>} : memref<32x32xf32, #tpu.memory_space<vmem>>, vector<32x32xf32>,
    %cst_1 = arith.constant 0.000000e+00 : f32
    %2 = vector.broadcast %cst_1 : f32 to vector<32x8xf32>
    %c0_2 = arith.constant 0 : index
    %c0_3 = arith.constant 0 : index
    %3 = vector.load %arg18[%c0_2, %c0_3] : memref<32x8xf32, #tpu.memory_space<vmem>>, vector<32x8xf32>
    tpu.vector_store %arg18[%c0_2, %c0_3], %2 {strides = array<i32>} : memref<32x8xf32, #tpu.memory_space<vmem>>, vector<32x8xf32>,
    %c0_4 = arith.constant 0 : index
    %c0_5 = arith.constant 0 : index
    %c0_6 = arith.constant 0 : index
    %4 = vector.load %arg1[%c0_4, %c0_5, %c0_6] : memref<1x16x8xf32, #tpu.memory_space<vmem>>, vector<1x16x8xf32>
    %5 = vector.shape_cast %4 : vector<1x16x8xf32> to vector<16x8xf32>
    %c8 = arith.constant 8 : index
    %c0_7 = arith.constant 0 : index
    %6 = vector.load %arg18[%c8, %c0_7] : memref<32x8xf32, #tpu.memory_space<vmem>>, vector<16x8xf32>
    tpu.vector_store %arg18[%c8, %c0_7], %5 {strides = array<i32>} : memref<32x8xf32, #tpu.memory_space<vmem>>, vector<16x8xf32>,
    %c0_8 = arith.constant 0 : index
    %c0_9 = arith.constant 0 : index
    %7 = vector.load %arg18[%c0_8, %c0_9] : memref<32x8xf32, #tpu.memory_space<vmem>>, vector<32x8xf32>
    %8 = vector.extract_strided_slice %7 {offsets = [7, 0], sizes = [16, 8], strides = [1, 1]} : vector<32x8xf32> to vector<16x8xf32>
    %9 = vector.extract_strided_slice %7 {offsets = [8, 0], sizes = [16, 8], strides = [1, 1]} : vector<32x8xf32> to vector<16x8xf32>
    %10 = vector.extract_strided_slice %7 {offsets = [9, 0], sizes = [16, 8], strides = [1, 1]} : vector<32x8xf32> to vector<16x8xf32>
    %11 = tpu.concatenate %8, %9, %10 in 1 : vector<16x8xf32>, vector<16x8xf32>, vector<16x8xf32> -> vector<16x24xf32>
    %12 = arith.truncf %11 : vector<16x24xf32> to vector<16x24xbf16>
    %c0_10 = arith.constant 0 : index
    %c0_11 = arith.constant 0 : index
    %13 = vector.load %arg2[%c0_10, %c0_11] : memref<24x32xbf16, #tpu.memory_space<vmem>>, vector<24x32xbf16>
    %cst_12 = arith.constant dense<0.000000e+00> : vector<16x32xf32>
    %14 = tpu.matmul %12, %13, %cst_12 {dimension_numbers = #tpu.dot_dimension_numbers<[1], [0], [0], [1], [0, 0, 1, 1], [], []>} : vector<16x24xbf16>, vector<24x32xbf16>, vector<16x32xf32> -> vector<16x32xf32>
    %c0_13 = arith.constant 0 : index
    %c0_14 = arith.constant 0 : index
    %15 = vector.load %arg3[%c0_13, %c0_14] : memref<1x32xf32, #tpu.memory_space<vmem>>, vector<1x32xf32>
    %16 = vector.broadcast %15 : vector<1x32xf32> to vector<16x32xf32>
    %17 = arith.addf %14, %16 : vector<16x32xf32>
    %c8_15 = arith.constant 8 : index
    %c0_16 = arith.constant 0 : index
    %18 = vector.load %arg17[%c8_15, %c0_16] : memref<32x32xf32, #tpu.memory_space<vmem>>, vector<16x32xf32>
    tpu.vector_store %arg17[%c8_15, %c0_16], %17 {strides = array<i32>} : memref<32x32xf32, #tpu.memory_space<vmem>>, vector<16x32xf32>,
    %c0_17 = arith.constant 0 : index
    %c0_18 = arith.constant 0 : index
    %19 = vector.load %arg17[%c0_17, %c0_18] : memref<32x32xf32, #tpu.memory_space<vmem>>, vector<32x32xf32>
    %20 = vector.extract_strided_slice %19 {offsets = [8, 0], sizes = [16, 32], strides = [1, 1]} : vector<32x32xf32> to vector<16x32xf32>
    %cst_19 = arith.constant 0.000000e+00 : f32
    %21 = vector.broadcast %cst_19 : f32 to vector<32x32xf32>
    %22 = arith.maximumf %19, %21 : vector<32x32xf32>
    %23 = vector.extract_strided_slice %22 {offsets = [7, 0], sizes = [16, 32], strides = [1, 1]} : vector<32x32xf32> to vector<16x32xf32>
    %24 = vector.extract_strided_slice %22 {offsets = [8, 0], sizes = [16, 32], strides = [1, 1]} : vector<32x32xf32> to vector<16x32xf32>
    %25 = vector.extract_strided_slice %22 {offsets = [9, 0], sizes = [16, 32], strides = [1, 1]} : vector<32x32xf32> to vector<16x32xf32>
    %26 = tpu.concatenate %23, %24, %25 in 1 : vector<16x32xf32>, vector<16x32xf32>, vector<16x32xf32> -> vector<16x96xf32>
    %27 = arith.truncf %26 : vector<16x96xf32> to vector<16x96xbf16>
    %c0_20 = arith.constant 0 : index
    %c0_21 = arith.constant 0 : index
    %28 = vector.load %arg4[%c0_20, %c0_21] : memref<96x32xbf16, #tpu.memory_space<vmem>>, vector<96x32xbf16>
    %cst_22 = arith.constant dense<0.000000e+00> : vector<16x32xf32>
    %29 = tpu.matmul %27, %28, %cst_22 {dimension_numbers = #tpu.dot_dimension_numbers<[1], [0], [0], [1], [0, 0, 1, 1], [], []>} : vector<16x96xbf16>, vector<96x32xbf16>, vector<16x32xf32> -> vector<16x32xf32>
    %c0_23 = arith.constant 0 : index
    %c0_24 = arith.constant 0 : index
    %30 = vector.load %arg5[%c0_23, %c0_24] : memref<1x32xf32, #tpu.memory_space<vmem>>, vector<1x32xf32>
    %31 = vector.broadcast %30 : vector<1x32xf32> to vector<16x32xf32>
    %32 = arith.addf %29, %31 : vector<16x32xf32>
    %cst_25 = arith.constant 0.000000e+00 : f32
    %33 = vector.broadcast %cst_25 : f32 to vector<16x32xf32>
    %34 = arith.maximumf %32, %33 : vector<16x32xf32>
    %35 = arith.truncf %34 : vector<16x32xf32> to vector<16x32xbf16>
    %c0_26 = arith.constant 0 : index
    %c0_27 = arith.constant 0 : index
    %36 = vector.load %arg6[%c0_26, %c0_27] : memref<32x32xbf16, #tpu.memory_space<vmem>>, vector<32x32xbf16>
    %cst_28 = arith.constant dense<0.000000e+00> : vector<16x32xf32>
    %37 = tpu.matmul %35, %36, %cst_28 {dimension_numbers = #tpu.dot_dimension_numbers<[1], [0], [0], [1], [0, 0, 1, 1], [], []>} : vector<16x32xbf16>, vector<32x32xbf16>, vector<16x32xf32> -> vector<16x32xf32>
    %c0_29 = arith.constant 0 : index
    %c0_30 = arith.constant 0 : index
    %38 = vector.load %arg7[%c0_29, %c0_30] : memref<1x32xf32, #tpu.memory_space<vmem>>, vector<1x32xf32>
    %39 = vector.broadcast %38 : vector<1x32xf32> to vector<16x32xf32>
    %40 = arith.addf %37, %39 : vector<16x32xf32>
    %41 = arith.addf %20, %40 : vector<16x32xf32>
    %c8_31 = arith.constant 8 : index
    %c0_32 = arith.constant 0 : index
    %42 = vector.load %arg17[%c8_31, %c0_32] : memref<32x32xf32, #tpu.memory_space<vmem>>, vector<16x32xf32>
    tpu.vector_store %arg17[%c8_31, %c0_32], %41 {strides = array<i32>} : memref<32x32xf32, #tpu.memory_space<vmem>>, vector<16x32xf32>,
    %c0_33 = arith.constant 0 : index
    %c0_34 = arith.constant 0 : index
    %43 = vector.load %arg17[%c0_33, %c0_34] : memref<32x32xf32, #tpu.memory_space<vmem>>, vector<32x32xf32>
    %44 = vector.extract_strided_slice %43 {offsets = [8, 0], sizes = [16, 32], strides = [1, 1]} : vector<32x32xf32> to vector<16x32xf32>
    %cst_35 = arith.constant 0.000000e+00 : f32
    %45 = vector.broadcast %cst_35 : f32 to vector<32x32xf32>
    %46 = arith.maximumf %43, %45 : vector<32x32xf32>
    %47 = vector.extract_strided_slice %46 {offsets = [6, 0], sizes = [16, 32], strides = [1, 1]} : vector<32x32xf32> to vector<16x32xf32>
    %48 = vector.extract_strided_slice %46 {offsets = [8, 0], sizes = [16, 32], strides = [1, 1]} : vector<32x32xf32> to vector<16x32xf32>
    %49 = vector.extract_strided_slice %46 {offsets = [10, 0], sizes = [16, 32], strides = [1, 1]} : vector<32x32xf32> to vector<16x32xf32>
    %50 = tpu.concatenate %47, %48, %49 in 1 : vector<16x32xf32>, vector<16x32xf32>, vector<16x32xf32> -> vector<16x96xf32>
    %51 = arith.truncf %50 : vector<16x96xf32> to vector<16x96xbf16>
    %c0_36 = arith.constant 0 : index
    %c0_37 = arith.constant 0 : index
    %52 = vector.load %arg8[%c0_36, %c0_37] : memref<96x32xbf16, #tpu.memory_space<vmem>>, vector<96x32xbf16>
    %cst_38 = arith.constant dense<0.000000e+00> : vector<16x32xf32>
    %53 = tpu.matmul %51, %52, %cst_38 {dimension_numbers = #tpu.dot_dimension_numbers<[1], [0], [0], [1], [0, 0, 1, 1], [], []>} : vector<16x96xbf16>, vector<96x32xbf16>, vector<16x32xf32> -> vector<16x32xf32>
    %c0_39 = arith.constant 0 : index
    %c0_40 = arith.constant 0 : index
    %54 = vector.load %arg9[%c0_39, %c0_40] : memref<1x32xf32, #tpu.memory_space<vmem>>, vector<1x32xf32>
    %55 = vector.broadcast %54 : vector<1x32xf32> to vector<16x32xf32>
    %56 = arith.addf %53, %55 : vector<16x32xf32>
    %cst_41 = arith.constant 0.000000e+00 : f32
    %57 = vector.broadcast %cst_41 : f32 to vector<16x32xf32>
    %58 = arith.maximumf %56, %57 : vector<16x32xf32>
    %59 = arith.truncf %58 : vector<16x32xf32> to vector<16x32xbf16>
    %c0_42 = arith.constant 0 : index
    %c0_43 = arith.constant 0 : index
    %60 = vector.load %arg10[%c0_42, %c0_43] : memref<32x32xbf16, #tpu.memory_space<vmem>>, vector<32x32xbf16>
    %cst_44 = arith.constant dense<0.000000e+00> : vector<16x32xf32>
    %61 = tpu.matmul %59, %60, %cst_44 {dimension_numbers = #tpu.dot_dimension_numbers<[1], [0], [0], [1], [0, 0, 1, 1], [], []>} : vector<16x32xbf16>, vector<32x32xbf16>, vector<16x32xf32> -> vector<16x32xf32>
    %c0_45 = arith.constant 0 : index
    %c0_46 = arith.constant 0 : index
    %62 = vector.load %arg11[%c0_45, %c0_46] : memref<1x32xf32, #tpu.memory_space<vmem>>, vector<1x32xf32>
    %63 = vector.broadcast %62 : vector<1x32xf32> to vector<16x32xf32>
    %64 = arith.addf %61, %63 : vector<16x32xf32>
    %65 = arith.addf %44, %64 : vector<16x32xf32>
    %c8_47 = arith.constant 8 : index
    %c0_48 = arith.constant 0 : index
    %66 = vector.load %arg17[%c8_47, %c0_48] : memref<32x32xf32, #tpu.memory_space<vmem>>, vector<16x32xf32>
    tpu.vector_store %arg17[%c8_47, %c0_48], %65 {strides = array<i32>} : memref<32x32xf32, #tpu.memory_space<vmem>>, vector<16x32xf32>,
    %c0_49 = arith.constant 0 : index
    %c0_50 = arith.constant 0 : index
    %67 = vector.load %arg17[%c0_49, %c0_50] : memref<32x32xf32, #tpu.memory_space<vmem>>, vector<32x32xf32>
    %68 = vector.extract_strided_slice %67 {offsets = [7, 0], sizes = [16, 32], strides = [1, 1]} : vector<32x32xf32> to vector<16x32xf32>
    %69 = arith.truncf %68 : vector<16x32xf32> to vector<16x32xbf16>
    %70 = vector.extract_strided_slice %67 {offsets = [8, 0], sizes = [16, 32], strides = [1, 1]} : vector<32x32xf32> to vector<16x32xf32>
    %71 = arith.truncf %70 : vector<16x32xf32> to vector<16x32xbf16>
    %72 = vector.extract_strided_slice %67 {offsets = [9, 0], sizes = [16, 32], strides = [1, 1]} : vector<32x32xf32> to vector<16x32xf32>
    %73 = arith.truncf %72 : vector<16x32xf32> to vector<16x32xbf16>
    %c0_51 = arith.constant 0 : index
    %c0_52 = arith.constant 0 : index
    %74 = vector.load %arg12[%c0_51, %c0_52] : memref<32x64xbf16, #tpu.memory_space<vmem>>, vector<32x64xbf16>
    %cst_53 = arith.constant dense<0.000000e+00> : vector<16x64xf32>
    %75 = tpu.matmul %71, %74, %cst_53 {dimension_numbers = #tpu.dot_dimension_numbers<[1], [0], [0], [1], [0, 0, 1, 1], [], []>} : vector<16x32xbf16>, vector<32x64xbf16>, vector<16x64xf32> -> vector<16x64xf32>
    %c0_54 = arith.constant 0 : index
    %c0_55 = arith.constant 0 : index
    %76 = vector.load %arg13[%c0_54, %c0_55] : memref<32x32xbf16, #tpu.memory_space<vmem>>, vector<32x32xbf16>
    %cst_56 = arith.constant dense<0.000000e+00> : vector<16x32xf32>
    %77 = tpu.matmul %69, %76, %cst_56 {dimension_numbers = #tpu.dot_dimension_numbers<[1], [0], [0], [1], [0, 0, 1, 1], [], []>} : vector<16x32xbf16>, vector<32x32xbf16>, vector<16x32xf32> -> vector<16x32xf32>
    %c0_57 = arith.constant 0 : index
    %c0_58 = arith.constant 0 : index
    %78 = vector.load %arg15[%c0_57, %c0_58] : memref<1x32xf32, #tpu.memory_space<vmem>>, vector<1x32xf32>
    %79 = vector.broadcast %78 : vector<1x32xf32> to vector<16x32xf32>
    %80 = arith.addf %77, %79 : vector<16x32xf32>
    %c0_59 = arith.constant 0 : index
    %c0_60 = arith.constant 0 : index
    %81 = vector.load %arg14[%c0_59, %c0_60] : memref<32x32xbf16, #tpu.memory_space<vmem>>, vector<32x32xbf16>
    %cst_61 = arith.constant dense<0.000000e+00> : vector<16x32xf32>
    %82 = tpu.matmul %73, %81, %cst_61 {dimension_numbers = #tpu.dot_dimension_numbers<[1], [0], [0], [1], [0, 0, 1, 1], [], []>} : vector<16x32xbf16>, vector<32x32xbf16>, vector<16x32xf32> -> vector<16x32xf32>
    %c0_62 = arith.constant 0 : index
    %c0_63 = arith.constant 0 : index
    %83 = vector.load %arg15[%c0_62, %c0_63] : memref<1x32xf32, #tpu.memory_space<vmem>>, vector<1x32xf32>
    %84 = vector.broadcast %83 : vector<1x32xf32> to vector<16x32xf32>
    %85 = arith.addf %82, %84 : vector<16x32xf32>
    %86 = tpu.concatenate %80, %85 in 1 : vector<16x32xf32>, vector<16x32xf32> -> vector<16x64xf32>
    %87 = arith.addf %75, %86 : vector<16x64xf32>
    %88 = arith.truncf %87 : vector<16x64xf32> to vector<16x64xbf16>
    %c0_64 = arith.constant 0 : index
    %c0_65 = arith.constant 0 : index
    %c0_66 = arith.constant 0 : index
    %89 = vector.load %arg16[%c0_64, %c0_65, %c0_66] : memref<1x16x64xbf16, #tpu.memory_space<vmem>>, vector<1x16x64xbf16>
    %90 = vector.shape_cast %89 : vector<1x16x64xbf16> to vector<16x64xbf16>
    %91 = vector.shape_cast %88 : vector<16x64xbf16> to vector<1x16x64xbf16>
    tpu.vector_store %arg16[%c0_64, %c0_65, %c0_66], %91 {strides = array<i32>} : memref<1x16x64xbf16, #tpu.memory_space<vmem>>, vector<1x16x64xbf16>,
    return
  }
  func.func @transform_0(%arg0: i32) -> (i32, i32, i32) {
    %c0_i32 = arith.constant 0 : i32
    %c0_i32_0 = arith.constant 0 : i32
    %c0_i32_1 = arith.constant 0 : i32
    return %arg0, %c0_i32, %c0_i32_0 : i32, i32, i32
  }
  func.func @transform_1(%arg0: i32) -> (i32, i32) {
    %c0_i32 = arith.constant 0 : i32
    %c0_i32_0 = arith.constant 0 : i32
    %c0_i32_1 = arith.constant 0 : i32
    return %c0_i32, %c0_i32_0 : i32, i32
  }
  func.func @transform_2(%arg0: i32) -> (i32, i32) {
    %c0_i32 = arith.constant 0 : i32
    %c0_i32_0 = arith.constant 0 : i32
    %c0_i32_1 = arith.constant 0 : i32
    return %c0_i32, %c0_i32_0 : i32, i32
  }
  func.func @transform_3(%arg0: i32) -> (i32, i32) {
    %c0_i32 = arith.constant 0 : i32
    %c0_i32_0 = arith.constant 0 : i32
    %c0_i32_1 = arith.constant 0 : i32
    return %c0_i32, %c0_i32_0 : i32, i32
  }
  func.func @transform_4(%arg0: i32) -> (i32, i32) {
    %c0_i32 = arith.constant 0 : i32
    %c0_i32_0 = arith.constant 0 : i32
    %c0_i32_1 = arith.constant 0 : i32
    return %c0_i32, %c0_i32_0 : i32, i32
  }
  func.func @transform_5(%arg0: i32) -> (i32, i32) {
    %c0_i32 = arith.constant 0 : i32
    %c0_i32_0 = arith.constant 0 : i32
    %c0_i32_1 = arith.constant 0 : i32
    return %c0_i32, %c0_i32_0 : i32, i32
  }
  func.func @transform_6(%arg0: i32) -> (i32, i32) {
    %c0_i32 = arith.constant 0 : i32
    %c0_i32_0 = arith.constant 0 : i32
    %c0_i32_1 = arith.constant 0 : i32
    return %c0_i32, %c0_i32_0 : i32, i32
  }
  func.func @transform_7(%arg0: i32) -> (i32, i32) {
    %c0_i32 = arith.constant 0 : i32
    %c0_i32_0 = arith.constant 0 : i32
    %c0_i32_1 = arith.constant 0 : i32
    return %c0_i32, %c0_i32_0 : i32, i32
  }
  func.func @transform_8(%arg0: i32) -> (i32, i32) {
    %c0_i32 = arith.constant 0 : i32
    %c0_i32_0 = arith.constant 0 : i32
    %c0_i32_1 = arith.constant 0 : i32
    return %c0_i32, %c0_i32_0 : i32, i32
  }
  func.func @transform_9(%arg0: i32) -> (i32, i32) {
    %c0_i32 = arith.constant 0 : i32
    %c0_i32_0 = arith.constant 0 : i32
    %c0_i32_1 = arith.constant 0 : i32
    return %c0_i32, %c0_i32_0 : i32, i32
  }
  func.func @transform_10(%arg0: i32) -> (i32, i32) {
    %c0_i32 = arith.constant 0 : i32
    %c0_i32_0 = arith.constant 0 : i32
    %c0_i32_1 = arith.constant 0 : i32
    return %c0_i32, %c0_i32_0 : i32, i32
  }
  func.func @transform_11(%arg0: i32) -> (i32, i32) {
    %c0_i32 = arith.constant 0 : i32
    %c0_i32_0 = arith.constant 0 : i32
    %c0_i32_1 = arith.constant 0 : i32
    return %c0_i32, %c0_i32_0 : i32, i32
  }
  func.func @transform_12(%arg0: i32) -> (i32, i32) {
    %c0_i32 = arith.constant 0 : i32
    %c0_i32_0 = arith.constant 0 : i32
    %c0_i32_1 = arith.constant 0 : i32
    return %c0_i32, %c0_i32_0 : i32, i32
  }
  func.func @transform_13(%arg0: i32) -> (i32, i32) {
    %c0_i32 = arith.constant 0 : i32
    %c0_i32_0 = arith.constant 0 : i32
    %c0_i32_1 = arith.constant 0 : i32
    return %c0_i32, %c0_i32_0 : i32, i32
  }
  func.func @transform_14(%arg0: i32) -> (i32, i32) {
    %c0_i32 = arith.constant 0 : i32
    %c0_i32_0 = arith.constant 0 : i32
    %c0_i32_1 = arith.constant 0 : i32
    return %c0_i32, %c0_i32_0 : i32, i32
  }
  func.func @transform_15(%arg0: i32) -> (i32, i32, i32) {
    %c0_i32 = arith.constant 0 : i32
    %c0_i32_0 = arith.constant 0 : i32
    %c0_i32_1 = arith.constant 0 : i32
    return %arg0, %c0_i32, %c0_i32_0 : i32, i32, i32
  }
}

</mosaic_0001>

<bundles_post_ra>
// kernel: _lambda_.2
= control target key start
LH: loop header
LB: loop body
LE: loop exit
PB: predicated region body
PF: predicated region fallthrough
CT: control target
= control target key end

     0   :  { %s2523_s0 = inlined_call_operand.vmem [shape: f32[2,16,8], index: 0, kind: input, shape index: {}]   ;;  %s2524_s1 = inlined_call_operand.hbm [shape: bf16[24,32], index: 1, kind: input, shape index: {}]   ;;  %s2525_s2 = inlined_call_operand.hbm [shape: f32[1,32], index: 2, kind: input, shape index: {}]   ;;  %s2526_s3 = inlined_call_operand.hbm [shape: bf16[96,32], index: 3, kind: input, shape index: {}]   ;;  %s2527_s4 = inlined_call_operand.hbm [shape: f32[1,32], index: 4, kind: input, shape index: {}]   ;;  %s2528_s5 = inlined_call_operand.hbm [shape: bf16[32,32], index: 5, kind: input, shape index: {}]   ;;  %s2529_s6 = inlined_call_operand.vmem [shape: f32[1,32], index: 6, kind: input, shape index: {}]   ;;  %s2530_s7 = inlined_call_operand.vmem [shape: bf16[96,32], index: 7, kind: input, shape index: {}]   ;;  %s2531_s8 = inlined_call_operand.vmem [shape: f32[1,32], index: 8, kind: input, shape index: {}]   ;;  %s2532_s9 = inlined_call_operand.hbm [shape: bf16[32,32], index: 9, kind: input, shape index: {}]   ;;  %s2533_s10 = inlined_call_operand.vmem [shape: f32[1,32], index: 10, kind: input, shape index: {}]   ;;  %s2534_s11 = inlined_call_operand.hbm [shape: bf16[32,64], index: 11, kind: input, shape index: {}]   ;;  %s2535_s12 = inlined_call_operand.vmem [shape: bf16[32,32], index: 12, kind: input, shape index: {}]   ;;  %s2536_s13 = inlined_call_operand.vmem [shape: bf16[32,32], index: 13, kind: input, shape index: {}]   ;;  %s2537_s14 = inlined_call_operand.vmem [shape: f32[1,32], index: 14, kind: input, shape index: {}]   ;;  %s2538_s15 = inlined_call_operand.vmem [shape: bf16[2,16,64], index: 15, kind: output, shape index: {}]  }
   0x1   :  { %2539 = sst [smem:[#allocation19_spill]] %s2525_s2 }
   0x2   :  { %20 = vsyncpa [#allocation5], 0 }
   0x3   :  { %21 = vsyncpa [#allocation7], 0 }
   0x4   :  { %22 = vsyncpa [#allocation10], 0 }
   0x5   :  { %23 = vsyncpa [#allocation13], 0  ;;  %s2193_s18 = smov 0  }
   0x6 LB: > { %s2098_s19 = smov [#allocation6]   ;;  %s2199_s21 = sadd.s32 4294967295, %s2096_s18   ;;  %s2096_s18 = sphi %s2193_s18, %s29_s18  }
   0x7   : > { %s406_s20 = sshll.u32 %s2098_s19, 4  ;;  %p1572_p0 = scmp.ge.s32.totalorder %s2096_s18, 1  ;;  %s407_s20 = int_to_ptr.vmem [resolvable:$true] %s406_s20 }
   0x8   : > { %p380_p1 = scmp.lt.s32.totalorder %s2096_s18, 3  ;;  %p1801_p2 = scmp.eq.s32.totalorder %s2199_s21, 0 }
   0x9   : > { %s2099_s23 = smov [#allocation9]   ;;  %s2100_s26 = smov [#allocation12]  }
   0xa   : > { %p2204_p3 = pnand %p1572_p0, %p380_p1  ;;  %s430_s24 = sshll.u32 %s2099_s23, 4  ;;  %s2210_s24 = int_to_ptr.vmem [resolvable:$true] %s430_s24 }
   0xb   : > { %s462_s27 = sshll.u32 %s2100_s26, 4  ;;  %s2101_s28 = smov [#allocation4]   ;;  %s2218_s27 = int_to_ptr.vmem [resolvable:$true] %s462_s27 }
   0xc   : > { %p1779_p4 = pneg %p2204_p3  ;;  %s2220_s29 = sshll.u32 %s2101_s28, 4  ;;  %s393_s29 = int_to_ptr.vmem [resolvable:$true] %s2220_s29 }
   0xd   : > { %s1903_s16 = scalar_lea.vmem %s407_s20, 16  ;;  %s1910_s17 = scalar_lea.vmem %s407_s20, 32 }
   0xe   : > { %p2214_p5 = pnand %p1801_p2, %p1779_p4  ;;  %p1904_p7 = scmp.ne.s32.totalorder %s407_s20, %s1903_s16 }
   0xf   : > { %p1911_p10 = scmp.lt.s32.totalorder %s407_s20, %s407_s20  ;;  %p1912_p11 = scmp.lt.s32.totalorder %s1910_s17, %s1903_s16 }
  0x10   : > { %p2224_p6 = pneg %p2214_p5 }
  0x11   : > { %p1913_p12 = por %p1912_p11, %p1911_p10 }
  0x12   : > { %p1906_p8 = pnand %p1904_p7, %p2224_p6 }
  0x14   : > { %p1907_p9 = pneg %p1906_p8 }
  0x16   : > { %p1914_p13 = pnand %p1913_p12, %p1907_p9 }
  0x18   : > { %1917 = shalt.err (!%p1914_p13)
}
  0x19   : > { %s2543_s2 = sld [smem:[#allocation19_spill]]  ;;  %s1929_s26 = scalar_lea.vmem %s2210_s24, 16 }
  0x1a   : > { %p1930_p0 = scmp.ne.s32.totalorder %s2210_s24, %s1929_s26  ;;  %s1936_s28 = scalar_lea.vmem %s2210_s24, 32 }
  0x1b   : > { %p1937_p7 = scmp.lt.s32.totalorder %s2210_s24, %s2210_s24  ;;  %p1938_p8 = scmp.lt.s32.totalorder %s1936_s28, %s1929_s26 }
  0x1c   : > { %p1932_p1 = pnand %p1930_p0, %p2224_p6 }
  0x1d   : > { %p1939_p9 = por %p1938_p8, %p1937_p7 }
  0x1e   : > { %p1933_p4 = pneg %p1932_p1 }
  0x1f   : > { %1785 = dma.hbm_to_vmem [thread:$0]  (!%p2214_p5), %s2543_s2, 16, %s407_s20, [#allocation7]  }
  0x20   : > { %p1940_p10 = pnand %p1939_p9, %p1933_p4 }
  0x22   : > { %1943 = shalt.err (!%p1940_p10)
}
  0x23   : > { %1791 = dma.hbm_to_vmem [thread:$0]  (!%p2214_p5), %s2527_s4, 16, %s2210_s24, [#allocation10]  }
  0x24   : > { %s1955_s20 = scalar_lea.vmem %s2218_s27, 256  ;;  %p1963_p0 = scmp.lt.s32.totalorder %s2218_s27, %s2218_s27 }
  0x25   : > { %p1956_p11 = scmp.ne.s32.totalorder %s2218_s27, %s1955_s20  ;;  %p1964_p1 = scmp.lt.s32.totalorder %s1955_s20, %s1955_s20 }
  0x27   : > { %p1958_p12 = pnand %p1956_p11, %p2224_p6  ;;  %p1965_p4 = por %p1964_p1, %p1963_p0 }
  0x29   : > { %p1959_p13 = pneg %p1958_p12 }
  0x2b   : > { %p1966_p7 = pnand %p1965_p4, %p1959_p13 }
  0x2d   : > { %1969 = shalt.err (!%p1966_p7)
}
  0x2e   : > { %s2102_s19 = smov 64   ;;  %s2103_s23 = smov 4  }
  0x2f   : > { %1797 = dma.hbm_to_vmem [thread:$0]  (!%p2214_p5), %s2532_s9, 256, %s2218_s27, [#allocation13], %s2102_s19, %s2102_s19, %s2103_s23  }
  0x30   : > { %s1981_s28 = scalar_lea.vmem %s393_s29, 192  ;;  %p1989_p11 = scmp.lt.s32.totalorder %s393_s29, %s393_s29 }
  0x31   : > { %p1982_p8 = scmp.ne.s32.totalorder %s393_s29, %s1981_s28  ;;  %p1990_p12 = scmp.lt.s32.totalorder %s1981_s28, %s1981_s28 }
  0x33   : > { %p1984_p9 = pnand %p1982_p8, %p2224_p6  ;;  %p1991_p13 = por %p1990_p12, %p1989_p11 }
  0x35   : > { %p1985_p10 = pneg %p1984_p9 }
  0x37   : > { %p1992_p0 = pnand %p1991_p13, %p1985_p10 }
  0x39   : > { %1995 = shalt.err (!%p1992_p0)
}
  0x3a   : > { %1782 = dma.hbm_to_vmem [thread:$0]  (!%p2214_p5), %s2524_s1, 192, %s393_s29, [#allocation5], %s2102_s19, %s2102_s19, %s2103_s23  }
  0x3b   : > { %s2104_s27 = smov [#allocation8]   ;;  %s2105_s24 = smov [#allocation11]  }
  0x3c   : > { %s416_s20 = sshll.u32 %s2104_s27, 4  ;;  %s440_s26 = sshll.u32 %s2105_s24, 4  ;;  %s417_s20 = int_to_ptr.vmem [resolvable:$true] %s416_s20  ;;  %s441_s26 = int_to_ptr.vmem [resolvable:$true] %s440_s26 }
  0x3d   : > { %s2007_s2 = scalar_lea.vmem %s417_s20, 768  ;;  %p2015_p8 = scmp.lt.s32.totalorder %s417_s20, %s417_s20 }
  0x3e   : > { %p2008_p1 = scmp.ne.s32.totalorder %s417_s20, %s2007_s2  ;;  %p2016_p9 = scmp.lt.s32.totalorder %s2007_s2, %s2007_s2 }
  0x40   : > { %p2010_p4 = pnand %p2008_p1, %p2224_p6  ;;  %p2017_p10 = por %p2016_p9, %p2015_p8 }
  0x42   : > { %p2011_p7 = pneg %p2010_p4 }
  0x44   : > { %p2018_p11 = pnand %p2017_p10, %p2011_p7 }
  0x46   : > { %2021 = shalt.err (!%p2018_p11)
}
  0x47   : > { %1788 = dma.hbm_to_vmem [thread:$0]  (!%p2214_p5), %s2526_s3, 768, %s417_s20, [#allocation7], %s2102_s19, %s2102_s19, %s2103_s23  }
  0x48   : > { %s2033_s16 = scalar_lea.vmem %s441_s26, 256  ;;  %p2041_p1 = scmp.lt.s32.totalorder %s441_s26, %s441_s26 }
  0x49   : > { %p2034_p12 = scmp.ne.s32.totalorder %s441_s26, %s2033_s16  ;;  %p2042_p4 = scmp.lt.s32.totalorder %s2033_s16, %s2033_s16 }
  0x4b   : > { %p2036_p13 = pnand %p2034_p12, %p2224_p6  ;;  %p2043_p7 = por %p2042_p4, %p2041_p1 }
  0x4d   : > { %p2037_p0 = pneg %p2036_p13 }
  0x4f   : > { %p2044_p8 = pnand %p2043_p7, %p2037_p0 }
  0x51   : > { %2047 = shalt.err (!%p2044_p8)
}
  0x52   : > { %1794 = dma.hbm_to_vmem [thread:$0]  (!%p2214_p5), %s2528_s5, 256, %s441_s26, [#allocation10], %s2102_s19, %s2102_s19, %s2103_s23  }
  0x53   : > { %s2106_s27 = smov [#allocation14]  }
  0x54   : > { %s478_s20 = sshll.u32 %s2106_s27, 4  ;;  %s479_s20 = int_to_ptr.vmem [resolvable:$true] %s478_s20 }
  0x55   : > { %s2059_s24 = scalar_lea.vmem %s479_s20, 256  ;;  %p2067_p12 = scmp.lt.s32.totalorder %s479_s20, %s479_s20 }
  0x56   : > { %p2060_p9 = scmp.ne.s32.totalorder %s479_s20, %s2059_s24  ;;  %p2068_p13 = scmp.lt.s32.totalorder %s2059_s24, %s2059_s24 }
  0x58   : > { %p2062_p10 = pnand %p2060_p9, %p2224_p6  ;;  %p2069_p0 = por %p2068_p13, %p2067_p12 }
  0x5a   : > { %p2063_p11 = pneg %p2062_p10 }
  0x5c   : > { %p2070_p1 = pnand %p2069_p0, %p2063_p11 }
  0x5e   : > { %2073 = shalt.err (!%p2070_p1)
}
  0x5f   : > { %1800 = dma.hbm_to_vmem [thread:$0]  (!%p2214_p5), %s2534_s11, 256, %s479_s20, [#allocation13], %s2102_s19, %s2102_s19, %s2103_s23  }
  0x60   : > { %511 = sbr.rel (%p2204_p3) target bundleno = 1889 (0x761), region = 80 }
  0x65   : > { %2079 = dma.done.wait (%p1801_p2), [#allocation5], 192  }
  0x66   : > { %2081 = vsyncadd (%p1801_p2), [#allocation5], 4294967104 }
  0x67   : > { %2083 = dma.done.wait (%p1801_p2), [#allocation7], 784  }
  0x68   : > { %2085 = vsyncadd (%p1801_p2), [#allocation7], 4294966512 }
  0x69   : > { %2087 = dma.done.wait (%p1801_p2), [#allocation10], 272  }
  0x6a   : > { %2089 = vsyncadd (%p1801_p2), [#allocation10], 4294967024 }
  0x6b   : > { %2091 = dma.done.wait (%p1801_p2), [#allocation13], 512  }
  0x6c   : > { %2093 = vsyncadd (%p1801_p2), [#allocation13], 4294966784  ;;  %p583_p3 = scmp.lt.s32.totalorder %s2199_s21, 1  ;;  %vm599_vm0 = vcmask 64512   ;;  %v2107_v0 = vmov 0.0   ;;  %vm614_vm1 = vcmask 1046528  }
  0x6d   : > { %601 = vst.msk [vmem:[#allocation3 + $0x8] sm:$0xff] %vm599_vm0, %v2107_v0  ;;  %602 = vst.msk [vmem:[#allocation3 + $0x10] sm:$0xff] %vm599_vm0, %v2107_v0  ;;  %1671 = vmatprep.subr.bf16.mxu0 %v2107_v0  ;;  %1679 = vmatprep.subr.bf16.mxu1 %v2107_v0  ;;  %vm628_vm2 = vcmask 1045504   ;;  %v1868_v3 = vld [vmem:[#allocation4 + $0x8] ss:$0 sps:$4 sm:$0xff]   ;;  %vm693_vm3 = vcmask 1043456  }
  0x6e   : > { %600 = vst.msk [vmem:[#allocation3] sm:$0xff] %vm599_vm0, %v2107_v0  ;;  %603 = vst.msk [vmem:[#allocation3 + $0x18] sm:$0xff] %vm599_vm0, %v2107_v0  ;;  %s2545_s21 = smov (!%p583_p3, %s2199_s21), 1  ;;  %v695_v7 = vsel %vm693_vm3, %v1868_v3, 0  ;;  %v1869_v15 = vld [vmem:[#allocation4] sm:$0xff]   ;;  %s2108_s23 = smov 8  }
  0x6f   : > { %s1635_s22 = sshll.u32 %s2545_s21, 4  ;;  %1672 = vmatpush3.bf16.msra.mxu0 %v695_v7  ;;  %s2109_s28 = smov 16   ;;  %vm2110_vm4 = vmmov 0   ;;  %vm594_vm5 = vcmask 261120   ;;  %vm646_vm6 = vcmask 130048   ;;  %vm689_vm8 = vcmask 195584  }
  0x70   : > { %s587_s19 = scalar_lea.vmem %s2523_s0, %s1635_s22  ;;  %1673 = vmatprep.subr.bf16.mxu0 %v2107_v0  ;;  %1675 = vmatprep.mubr.msk.bf16.mxu0 %vm2110_vm4, %v2107_v0  ;;  %596 = vst.msk [vmem:[#allocation2 + $0x8] sm:$0xff] %vm594_vm5, %v2107_v0  ;;  %595 = vst.msk [vmem:[#allocation2] sm:$0xff] %vm594_vm5, %v2107_v0  ;;  %vm662_vm7 = vsmask.f32 4352  ;;  %v1870_v47 = vld [vmem:[#allocation8 + $0x28] sm:$0xff]   ;;  %v1871_v53 = vld [vmem:[#allocation8 + $0x20] sm:$0xff]  }
  0x71   : > { %v604_v1 = vld [vmem:[%s587_s19] sm:$0xff]  ;;  %v605_v2 = vld [vmem:[%s587_s19 + $0x8] sm:$0xff]  ;;  %1691 = vmatprep.mubr.msk.bf16.mxu1 %vm2110_vm4, %v2107_v0  ;;  %597 = vst.msk [vmem:[#allocation2 + $0x10] sm:$0xff] %vm594_vm5, %v2107_v0  ;;  %598 = vst.msk [vmem:[#allocation2 + $0x18] sm:$0xff] %vm594_vm5, %v2107_v0  ;;  %1680 = vmatpush3.bf16.msra.mxu1 %v1870_v47  ;;  %s2111_s16 = smov 32   ;;  %s2112_s2 = smov 64  }
  0x72   : > { %606 = vst.msk [vmem:[#allocation3 + $0x8] sm:$0xff] %vm599_vm0, %v604_v1  ;;  %607 = vst.msk [vmem:[#allocation3 + $0x10] sm:$0xff] %vm599_vm0, %v605_v2  ;;  %1681 = vmatprep.subr.bf16.mxu1 %v2107_v0  ;;  %v1593_v48 = vld [vmem:[#allocation6] ss:$0 sm:$0xff]  ;;  %v1873_v59 = vld [vmem:[#allocation8 + $0x10] sm:$0xff]   ;;  %vm780_vm9 = vcmask 523264  }
  0x73   : > { %1674 = vmatpush3.bf16.msra.mxu0 %v1869_v15  ;;  %v1872_v56 = vld [vmem:[#allocation8 + $0x18] sm:$0xff]   ;;  %v1874_v1 = vld [vmem:[#allocation8 + $0x8] sm:$0xff]   ;;  %vm858_vm10 = vcmask 785408   ;;  %vm1043_vm11 = vcmask 1044480   ;;  %vm1301_vm12 = vsmask.f32 7424 }
  0x74   : > { %1695 = vmatprep.subr.bf16.mxu0 %v2107_v0  ;;  %s1636_s20 = sshll.u32 %s2545_s21, 3  ;;  %vm1443_vm13 = vcmask 519168  }
  0x75   : > { %v611_v4 = vld [vmem:[#allocation3 + $0x18] sm:$0xff]  ;;  %v608_v20 = vld [vmem:[#allocation3] sm:$0xff]  ;;  %1682 = vmatpush3.bf16.msra.mxu1 %v1871_v53  ;;  %s592_s26 = scalar_lea.vmem %s2538_s15, %s1636_s20 }
  0x76   : > { %v632_v14 = vrot.slane %v611_v4, 2  ;;  %1683 = vmatprep.subr.bf16.mxu1 %v2107_v0 }
  0x78   : > { %v2372_v58 = vld [vmem:[#allocation2 + $0x18] sm:$0xff] }
  0x79   : > { %v609_v5 = vld [vmem:[#allocation3 + $0x8] sm:$0xff]  ;;  %v610_v6 = vld [vmem:[#allocation3 + $0x10] sm:$0xff]  ;;  %1684 = vmatpush3.bf16.msra.mxu1 %v1872_v56  ;;  %v747_v62 = vmax.f32 %v2372_v58, 0.0 }
  0x7a   : > { %v615_v8 = vrot.slane %v609_v5, 1  ;;  %v616_v9 = vrot.slane %v610_v6, 1  ;;  %v629_v10 = vrot.slane %v609_v5, 2  ;;  %v630_v11 = vrot.slane %v610_v6, 2  ;;  %1685 = vmatprep.subr.bf16.mxu1 %v2107_v0  ;;  %v1605_v56 = vld [vmem:[%s2529_s6] ss:$0 sm:$0xff] }
  0x7c   : > { %v617_v12 = vsel %vm614_vm1, %v615_v8, %v616_v9  ;;  %v631_v13 = vsel %vm628_vm2, %v629_v10, %v630_v11  ;;  %v633_v18 = vsel %vm628_vm2, %v630_v11, %v632_v14  ;;  %v2392_v14 = vld [vmem:[#allocation2] sm:$0xff] }
  0x7d   : > { %v1838_v16 = vpack.i.bf16 %v617_v12, %v615_v8  ;;  %v1843_v17 = vpack.i.bf16 %v631_v13, %v629_v10  ;;  %1686 = vmatpush3.bf16.msra.mxu1 %v1873_v59 }
  0x7e   : > { %1687 = vmatprep.subr.bf16.mxu1 %v2107_v0 }
  0x7f   : > { %1839 = vrot.lane.b32.xlu0 %v1838_v16, %s2108_s23  ;;  %1844 = vrot.lane.b32.xlu1 %v1843_v17, %s2109_s28 }
  0x81   : > { %1688 = vmatpush3.bf16.msra.mxu1 %v1874_v1 }
  0x82   : > { %1689 = vmatprep.subr.bf16.mxu1 %v2107_v0 }
  0x83   : > { %622 = vrot.lane.b32.xlu0 %v616_v9, %s2108_s23  ;;  %638 = vrot.lane.b32.xlu1 %v633_v18, %s2109_s28  ;;  %v1875_v9 = vld [vmem:[#allocation8] sm:$0xff]  }
  0x85   : > { %1690 = vmatpush3.bf16.msra.mxu1 %v1875_v9 }
  0x86   : > { %1719 = vmatprep.subr.bf16.mxu1 %v2107_v0 }
  0xf1   : > { %v1840_v19 = vpop.permute.xlu0 %1839  ;;  %v1845_v21 = vpop.permute.xlu1 %1844 }
  0xf2   : > { %v1842_v22 = vunpack.i.h.bf16 %v1840_v19  ;;  %v1841_v23 = vunpack.i.l.bf16 %v1840_v19  ;;  %v1847_v24 = vunpack.i.h.bf16 %v1845_v21  ;;  %v1846_v25 = vunpack.i.l.bf16 %v1845_v21 }
  0xf4   : > { %v644_v26 = vsel %vm599_vm0, %v609_v5, %v1842_v22  ;;  %v643_v27 = vsel %vm599_vm0, %v608_v20, %v1841_v23  ;;  %v766_v5 = vrot.slane %v747_v62, 2  ;;  %v744_v20 = vmax.f32 %v2392_v14, 0.0 }
  0xf5   : > { %v623_v28 = vpop.permute.xlu0 %622  ;;  %v639_v29 = vpop.permute.xlu1 %638  ;;  %v647_v30 = vsel %vm646_vm6, %v643_v27, %v1846_v25  ;;  %v648_v31 = vsel %vm646_vm6, %v644_v26, %v1847_v24 }
  0xf6   : > { %v645_v32 = vsel %vm599_vm0, %v610_v6, %v623_v28  ;;  %v650_v33 = vpack.c.bf16 %v648_v31, %v647_v30 }
  0xf7   : > { %v649_v34 = vsel %vm646_vm6, %v645_v32, %v639_v29 }
  0xf8   : > { %v651_v35 = vpack.c.bf16 %v649_v34, %v649_v34  ;;  %v664_v36 = vshrl.u32 %v650_v33, 16  ;;  %v667_v37 = vshll.u32 %v650_v33, 16 }
  0xfa   : > { %v666_v38 = vrot.slane %v664_v36, 3  ;;  %v669_v39 = vrot.slane %v667_v37, 4  ;;  %v672_v40 = vshrl.u32 %v651_v35, 16  ;;  %v675_v41 = vshll.u32 %v651_v35, 16 }
  0xfc   : > { %v674_v42 = vrot.slane %v672_v40, 3  ;;  %v677_v43 = vrot.slane %v675_v41, 4  ;;  %v670_v45 = vor.u32 %v669_v39, %v666_v38 }
  0xfe   : > { %v678_v44 = vor.u32 %v677_v43, %v674_v42  ;;  %v1876_v42 = vld [vmem:[#allocation11 + $0x8] sm:$0xff]   ;;  %v1877_v43 = vld [vmem:[#allocation11] sm:$0xff]  }
 0x100   : > { %v679_v46 = vsel %vm662_vm7, %v670_v45, %v678_v44  ;;  %v1597_v44 = vld [vmem:[#allocation9] ss:$0 sm:$0xff] }
 0x101   : > { %1676 = vmatmul.mubr.msk.bf16.vlgmr.msra.gmra.mxu0 %vm689_vm8, %v679_v46 }
 0x102   : > { %1699 = vmatprep.mubr.msk.bf16.mxu0 %vm2110_vm4, %v2107_v0  ;;  %1696 = vmatpush3.bf16.msra.mxu0 %v1876_v42  ;;  %v1884_v42 = vld [vmem:[#allocation12 + $0x8] sm:$0xff]  }
 0x103   : > { %1697 = vmatprep.subr.bf16.mxu0 %v2107_v0 }
 0x106   : > { %1698 = vmatpush3.bf16.msra.mxu0 %v1877_v43  ;;  %v1609_v43 = vld [vmem:[%s2531_s8] ss:$0 sm:$0xff] }
 0x107   : > { %1703 = vmatprep.subr.bf16.mxu0 %v2107_v0 }
 0x1c1   : > { %v731_v49 = vpop.f32.mrf.mxu0 }
 0x1c2   : > { %v732_v50 = vadd.f32 %v1593_v48, %v731_v49 }
 0x1c3   : > { %v1677_v51 = vpop.f32.mrf.mxu0 }
 0x1c4   : > { %738 = vst.msk [vmem:[#allocation2 + $0x8] sm:$0xff] %vm594_vm5, %v732_v50 }
 0x1c5   : > { %v734_v52 = vpop.f32.mrf.mxu0 }
 0x1c6   : > { %v735_v54 = vadd.f32 %v1593_v48, %v734_v52 }
 0x1c7   : > { %v1678_v55 = vpop.f32.mrf.mxu0 }
 0x1c8   : > { %739 = vst.msk [vmem:[#allocation2 + $0x10] sm:$0xff] %vm594_vm5, %v735_v54  ;;  %v1878_v54 = vld [vmem:[%s2530_s7 + $0x28] sm:$0xff]   ;;  %v1879_v55 = vld [vmem:[%s2530_s7 + $0x20] sm:$0xff]  }
 0x1cb   : > { %v2370_v57 = vld [vmem:[#allocation2 + $0x8] sm:$0xff] }
 0x1cc   : > { %v745_v60 = vmax.f32 %v2370_v57, 0.0 }
 0x1ce   : > { %v750_v3 = vrot.slane %v745_v60, 1  ;;  %v763_v7 = vrot.slane %v745_v60, 2 }
 0x1cf   : > { %v2376_v61 = vld [vmem:[#allocation2 + $0x10] sm:$0xff] }
 0x1d0   : > { %v746_v63 = vmax.f32 %v2376_v61, 0.0 }
 0x1d2   : > { %v751_v2 = vrot.slane %v746_v63, 1  ;;  %v764_v4 = vrot.slane %v746_v63, 2 }
 0x1d4   : > { %757 = vrot.lane.b32.xlu1 %v751_v2, %s2111_s16  ;;  %v752_v6 = vsel %vm614_vm1, %v750_v3, %v751_v2  ;;  %v765_v10 = vsel %vm628_vm2, %v763_v7, %v764_v4  ;;  %v767_v11 = vsel %vm628_vm2, %v764_v4, %v766_v5  ;;  %v1880_v5 = vld [vmem:[%s2530_s7 + $0x18] sm:$0xff]  }
 0x1d5   : > { %v1848_v8 = vpack.i.bf16 %v752_v6, %v750_v3  ;;  %v1853_v12 = vpack.i.bf16 %v765_v10, %v763_v7 }
 0x1d7   : > { %1849 = vrot.lane.b32.xlu0 %v1848_v8, %s2111_s16  ;;  %v1882_v8 = vld [vmem:[%s2530_s7 + $0x8] sm:$0xff]  }
 0x1d8   : > { %772 = vrot.lane.b32.xlu1 %v767_v11, %s2112_s2  ;;  %v1883_v11 = vld [vmem:[%s2530_s7] sm:$0xff]  }
 0x1db   : > { %1854 = vrot.lane.b32.xlu0 %v1853_v12, %s2112_s2 }
 0x246   : > { %v758_v13 = vpop.permute.xlu1 %757 }
 0x247   : > { %v779_v16 = vsel %vm594_vm5, %v746_v63, %v758_v13 }
 0x249   : > { %v1850_v15 = vpop.permute.xlu0 %1849 }
 0x24a   : > { %v773_v17 = vpop.permute.xlu1 %772  ;;  %v1852_v18 = vunpack.i.h.bf16 %v1850_v15  ;;  %v1851_v19 = vunpack.i.l.bf16 %v1850_v15 }
 0x24b   : > { %v783_v21 = vsel %vm780_vm9, %v779_v16, %v773_v17  ;;  %v1003_v16 = vrot.slane %v747_v62, 4 }
 0x24c   : > { %v785_v22 = vpack.c.bf16 %v783_v21, %v783_v21  ;;  %v778_v26 = vsel %vm594_vm5, %v745_v60, %v1852_v18  ;;  %v777_v27 = vsel %vm594_vm5, %v744_v20, %v1851_v19 }
 0x24d   : > { %v1855_v23 = vpop.permute.xlu0 %1854 }
 0x24e   : > { %v1857_v24 = vunpack.i.h.bf16 %v1855_v23  ;;  %v1856_v25 = vunpack.i.l.bf16 %v1855_v23  ;;  %v814_v28 = vshrl.u32 %v785_v22, 16  ;;  %v817_v29 = vshll.u32 %v785_v22, 16 }
 0x250   : > { %v781_v30 = vsel %vm780_vm9, %v777_v27, %v1856_v25  ;;  %v782_v31 = vsel %vm780_vm9, %v778_v26, %v1857_v24  ;;  %v816_v33 = vrot.slane %v814_v28, 3  ;;  %v819_v34 = vrot.slane %v817_v29, 4 }
 0x251   : > { %v784_v32 = vpack.c.bf16 %v782_v31, %v781_v30 }
 0x252   : > { %v820_v39 = vor.u32 %v819_v34, %v816_v33 }
 0x253   : > { %v806_v35 = vshrl.u32 %v784_v32, 16  ;;  %v809_v36 = vshll.u32 %v784_v32, 16 }
 0x255   : > { %v808_v37 = vrot.slane %v806_v35, 3  ;;  %v811_v38 = vrot.slane %v809_v36, 4 }
 0x257   : > { %v812_v40 = vor.u32 %v811_v38, %v808_v37 }
 0x259   : > { %v821_v41 = vsel %vm662_vm7, %v812_v40, %v820_v39 }
 0x25a   : > { %1692 = vmatmul.mubr.msk.bf16.vlgmr.msra.gmra.mxu1 %vm858_vm10, %v821_v41 }
 0x25b   : > { %1723 = vmatprep.mubr.msk.bf16.mxu1 %vm2110_vm4, %v2107_v0  ;;  %1720 = vmatpush3.bf16.msra.mxu1 %v1884_v42 }
 0x25c   : > { %1721 = vmatprep.subr.bf16.mxu1 %v2107_v0 }
 0x31a   : > { %v896_v45 = vpop.f32.mrf.mxu1 }
 0x31b   : > { %v897_v47 = vadd.f32 %v1597_v44, %v896_v45 }
 0x31c   : > { %v1693_v46 = vpop.f32.mrf.mxu1 }
 0x31d   : > { %v903_v51 = vmax.f32 %v897_v47, 0.0 }
 0x31e   : > { %v899_v48 = vpop.f32.mrf.mxu1 }
 0x31f   : > { %v900_v49 = vadd.f32 %v1597_v44, %v899_v48 }
 0x320   : > { %v1694_v50 = vpop.f32.mrf.mxu1 }
 0x321   : > { %v904_v52 = vmax.f32 %v900_v49, 0.0 }
 0x323   : > { %v905_v53 = vpack.c.bf16 %v904_v52, %v903_v51 }
 0x325   : > { %1700 = vmatmul.mubr.msk.bf16.vlgmr.msra.gmra.mxu0 %vm594_vm5, %v905_v53  ;;  %v1886_v53 = vld [vmem:[%s2536_s13 + $0x8] sm:$0xff]  }
 0x326   : > { %1715 = vmatprep.mubr.msk.bf16.mxu0 %vm2110_vm4, %v2107_v0  ;;  %1704 = vmatpush3.bf16.msra.mxu0 %v1878_v54  ;;  %v1887_v54 = vld [vmem:[%s2535_s12 + $0x8] sm:$0xff]  }
 0x327   : > { %1705 = vmatprep.subr.bf16.mxu0 %v2107_v0 }
 0x32a   : > { %1706 = vmatpush3.bf16.msra.mxu0 %v1879_v55  ;;  %v1888_v55 = vld [vmem:[%s2536_s13] sm:$0xff]  }
 0x32b   : > { %1707 = vmatprep.subr.bf16.mxu0 %v2107_v0 }
 0x32e   : > { %1708 = vmatpush3.bf16.msra.mxu0 %v1880_v5 }
 0x32f   : > { %1709 = vmatprep.subr.bf16.mxu0 %v2107_v0 }
 0x3e5   : > { %v966_v59 = vpop.f32.mrf.mxu0 }
 0x3e6   : > { %v967_v60 = vadd.f32 %v1605_v56, %v966_v59  ;;  %v1617_v59 = vld [vmem:[%s2533_s10] ss:$0 sm:$0xff] }
 0x3e7   : > { %v1701_v63 = vpop.f32.mrf.mxu0 }
 0x3e8   : > { %v973_v1 = vadd.f32 %v967_v60, %v2370_v57  ;;  %v1881_v57 = vld [vmem:[%s2530_s7 + $0x10] sm:$0xff]  }
 0x3e9   : > { %v969_v2 = vpop.f32.mrf.mxu0  ;;  %1710 = vmatpush3.bf16.msra.mxu0 %v1881_v57 }
 0x3ea   : > { %975 = vst.msk [vmem:[#allocation2 + $0x8] sm:$0xff] %vm594_vm5, %v973_v1  ;;  %v970_v3 = vadd.f32 %v1605_v56, %v969_v2  ;;  %1711 = vmatprep.subr.bf16.mxu0 %v2107_v0  ;;  %v1889_v56 = vld [vmem:[%s2535_s12] sm:$0xff]  }
 0x3eb   : > { %v1702_v4 = vpop.f32.mrf.mxu0 }
 0x3ec   : > { %v974_v6 = vadd.f32 %v970_v3, %v2376_v61 }
 0x3ed   : > { %1712 = vmatpush3.bf16.msra.mxu0 %v1882_v8 }
 0x3ee   : > { %976 = vst.msk [vmem:[#allocation2 + $0x10] sm:$0xff] %vm594_vm5, %v974_v6  ;;  %1713 = vmatprep.subr.bf16.mxu0 %v2107_v0 }
 0x3f1   : > { %v2434_v7 = vld [vmem:[#allocation2 + $0x8] sm:$0xff]  ;;  %1714 = vmatpush3.bf16.msra.mxu0 %v1883_v11 }
 0x3f2   : > { %v982_v61 = vmax.f32 %v2434_v7, 0.0  ;;  %1735 = vmatprep.subr.bf16.mxu0 %v2107_v0 }
 0x3f4   : > { %v987_v13 = vrot.slane %v982_v61, 2  ;;  %v1000_v18 = vrot.slane %v982_v61, 4 }
 0x3f5   : > { %v2441_v9 = vld [vmem:[#allocation2 + $0x10] sm:$0xff] }
 0x3f6   : > { %v983_v10 = vmax.f32 %v2441_v9, 0.0 }
 0x3f8   : > { %v988_v12 = vrot.slane %v983_v10, 2  ;;  %v1001_v15 = vrot.slane %v983_v10, 4 }
 0x3fa   : > { %994 = vrot.lane.b32.xlu1 %v988_v12, %s2111_s16  ;;  %v989_v17 = vsel %vm628_vm2, %v987_v13, %v988_v12  ;;  %v1002_v21 = vsel %vm693_vm3, %v1000_v18, %v1001_v15  ;;  %v1004_v22 = vsel %vm693_vm3, %v1001_v15, %v1003_v16 }
 0x3fb   : > { %v1858_v19 = vpack.i.bf16 %v989_v17, %v987_v13  ;;  %v1863_v23 = vpack.i.bf16 %v1002_v21, %v1000_v18 }
 0x3fd   : > { %1859 = vrot.lane.b32.xlu0 %v1858_v19, %s2111_s16 }
 0x3fe   : > { %1009 = vrot.lane.b32.xlu1 %v1004_v22, %s2112_s2 }
 0x401   : > { %1864 = vrot.lane.b32.xlu0 %v1863_v23, %s2112_s2 }
 0x46c   : > { %v995_v62 = vpop.permute.xlu1 %994 }
 0x46d   : > { %v1016_v26 = vsel %vm594_vm5, %v983_v10, %v995_v62 }
 0x46f   : > { %v1860_v24 = vpop.permute.xlu0 %1859 }
 0x470   : > { %v1010_v25 = vpop.permute.xlu1 %1009  ;;  %v1862_v27 = vunpack.i.h.bf16 %v1860_v24  ;;  %v1861_v28 = vunpack.i.l.bf16 %v1860_v24 }
 0x471   : > { %v1019_v29 = vsel %vm780_vm9, %v1016_v26, %v1010_v25 }
 0x472   : > { %v1015_v33 = vsel %vm594_vm5, %v982_v61, %v1862_v27  ;;  %v1014_v34 = vsel %vm594_vm5, %v744_v20, %v1861_v28  ;;  %v1021_v35 = vpack.c.bf16 %v1019_v29, %v1019_v29  ;;  %v1885_v20 = vld [vmem:[#allocation12] sm:$0xff]   ;;  %v1208_v61 = vpack.c.bf16 %v2372_v58, %v2372_v58  ;;  %v1890_v58 = vld [vmem:[#allocation14 + $0x8] sm:$0xff]   ;;  %v1891_v29 = vld [vmem:[#allocation14] sm:$0xff]  }
 0x473   : > { %v1865_v30 = vpop.permute.xlu0 %1864  ;;  %1722 = vmatpush3.bf16.msra.mxu1 %v1885_v20 }
 0x474   : > { %v1867_v31 = vunpack.i.h.bf16 %v1865_v30  ;;  %v1866_v32 = vunpack.i.l.bf16 %v1865_v30  ;;  %v1045_v39 = vrot.slane %v1021_v35, 3  ;;  %1727 = vmatprep.subr.bf16.mxu1 %v2107_v0  ;;  %v1310_v15 = vshll.u32 %v1208_v61, 16  ;;  %v1621_v30 = vld [vmem:[%s2537_s14] ss:$0 sm:$0xff] }
 0x476   : > { %v1017_v36 = vsel %vm780_vm9, %v1014_v34, %v1866_v32  ;;  %v1018_v37 = vsel %vm780_vm9, %v1015_v33, %v1867_v31  ;;  %v1312_v24 = vrot.slane %v1310_v15, 1 }
 0x477   : > { %v1020_v38 = vpack.c.bf16 %v1018_v37, %v1017_v36 }
 0x479   : > { %v1044_v40 = vrot.slane %v1020_v38, 3 }
 0x47b   : > { %v1046_v41 = vsel %vm1043_vm11, %v1044_v40, %v1045_v39 }
 0x47c   : > { %1716 = vmatmul.mubr.msk.bf16.vlgmr.msra.gmra.mxu0 %vm858_vm10, %v1046_v41 }
 0x47d   : > { %1739 = vmatprep.mubr.msk.bf16.mxu0 %vm2110_vm4, %v2107_v0  ;;  %1736 = vmatpush3.bf16.msra.mxu0 %v1886_v53 }
 0x47e   : > { %1737 = vmatprep.subr.bf16.mxu0 %v2107_v0 }
 0x481   : > { %1738 = vmatpush3.bf16.msra.mxu0 %v1888_v55 }
 0x53c   : > { %v1120_v44 = vpop.f32.mrf.mxu0 }
 0x53d   : > { %v1121_v46 = vadd.f32 %v1609_v43, %v1120_v44 }
 0x53e   : > { %v1717_v45 = vpop.f32.mrf.mxu0 }
 0x53f   : > { %v1127_v50 = vmax.f32 %v1121_v46, 0.0 }
 0x540   : > { %v1123_v47 = vpop.f32.mrf.mxu0 }
 0x541   : > { %v1124_v48 = vadd.f32 %v1609_v43, %v1123_v47 }
 0x542   : > { %v1718_v49 = vpop.f32.mrf.mxu0 }
 0x543   : > { %v1128_v51 = vmax.f32 %v1124_v48, 0.0 }
 0x545   : > { %v1129_v52 = vpack.c.bf16 %v1128_v51, %v1127_v50 }
 0x547   : > { %1724 = vmatmul.mubr.msk.bf16.vlgmr.msra.gmra.mxu1 %vm594_vm5, %v1129_v52 }
 0x548   : > { %1731 = vmatprep.mubr.msk.bf16.mxu1 %vm2110_vm4, %v2107_v0  ;;  %1728 = vmatpush3.bf16.msra.mxu1 %v1887_v54 }
 0x549   : > { %1729 = vmatprep.subr.bf16.mxu1 %v2107_v0 }
 0x54c   : > { %1730 = vmatpush3.bf16.msra.mxu1 %v1889_v56 }
 0x54d   : > { %1743 = vmatprep.subr.bf16.mxu1 %v2107_v0 }
 0x607   : > { %v1190_v60 = vpop.f32.mrf.mxu1 }
 0x608   : > { %v1191_v63 = vadd.f32 %v1617_v59, %v1190_v60 }
 0x609   : > { %v1725_v1 = vpop.f32.mrf.mxu1 }
 0x60a   : > { %v1197_v2 = vadd.f32 %v1191_v63, %v2434_v7 }
 0x60b   : > { %v1193_v3 = vpop.f32.mrf.mxu1 }
 0x60c   : > { %1199 = vst.msk [vmem:[#allocation2 + $0x8] sm:$0xff] %vm594_vm5, %v1197_v2  ;;  %v1194_v4 = vadd.f32 %v1617_v59, %v1193_v3 }
 0x60d   : > { %v1726_v5 = vpop.f32.mrf.mxu1 }
 0x60e   : > { %v1198_v6 = vadd.f32 %v1194_v4, %v2441_v9 }
 0x610   : > { %1200 = vst.msk [vmem:[#allocation2 + $0x10] sm:$0xff] %vm594_vm5, %v1198_v6 }
 0x613   : > { %v1202_v57 = vld [vmem:[#allocation2 + $0x8] sm:$0xff] }
 0x614   : > { %v1205_v8 = vpack.c.bf16 %v1202_v57, %v2392_v14 }
 0x616   : > { %v1225_v10 = vshrl.u32 %v1205_v8, 16  ;;  %v1228_v11 = vshll.u32 %v1205_v8, 16 }
 0x617   : > { %v1203_v12 = vld [vmem:[#allocation2 + $0x10] sm:$0xff] }
 0x618   : > { %v1206_v13 = vpack.c.bf16 %v1203_v12, %v1203_v12  ;;  %v1207_v7 = vpack.c.bf16 %v1203_v12, %v1202_v57  ;;  %v1227_v16 = vrot.slane %v1225_v10, 3  ;;  %v1230_v17 = vrot.slane %v1228_v11, 4 }
 0x61a   : > { %v1233_v18 = vshrl.u32 %v1206_v13, 16  ;;  %v1236_v19 = vshll.u32 %v1206_v13, 16  ;;  %v1305_v21 = vshll.u32 %v1207_v7, 16  ;;  %v1303_v23 = vshrl.u32 %v1207_v7, 16 }
 0x61b   : > { %v1231_v14 = vor.u32 %v1230_v17, %v1227_v16 }
 0x61c   : > { %v1235_v9 = vrot.slane %v1233_v18, 3  ;;  %v1238_v22 = vrot.slane %v1236_v19, 4  ;;  %v1307_v62 = vrot.slane %v1305_v21, 1 }
 0x61e   : > { %v1239_v25 = vor.u32 %v1238_v22, %v1235_v9  ;;  %v1308_v26 = vor.u32 %v1307_v62, %v1303_v23 }
 0x620   : > { %v1240_v27 = vsel %vm662_vm7, %v1231_v14, %v1239_v25  ;;  %v1313_v28 = vsel %vm1301_vm12, %v1308_v26, %v1312_v24 }
 0x621   : > { %1732 = vmatmul.mubr.msk.bf16.vlgmr.msra.gmra.mxu1 %vm594_vm5, %v1240_v27  ;;  %1740 = vmatmul.mubr.msk.bf16.vlgmr.msra.gmra.mxu0 %vm594_vm5, %v1313_v28 }
 0x622   : > { %1744 = vmatpush3.bf16.msra.mxu1 %v1890_v58  ;;  %1747 = vmatprep.mubr.msk.bf16.mxu1 %vm2110_vm4, %v2107_v0 }
 0x623   : > { %1745 = vmatprep.subr.bf16.mxu1 %v2107_v0 }
 0x626   : > { %1746 = vmatpush3.bf16.msra.mxu1 %v1891_v29 }
 0x629   : > { %1748 = vmatmul.mubr.msk.bf16.vlgmr.msra.gmra.mxu1 %vm594_vm5, %v1207_v7 }
 0x6e1   : > { %v1290_v31 = vpop.f32.mrf.mxu1  ;;  %v1363_v33 = vpop.f32.mrf.mxu0 }
 0x6e2   : > { %v1291_v32 = vadd.f32 %v1621_v30, %v1290_v31  ;;  %v1364_v34 = vadd.f32 %v1621_v30, %v1363_v33 }
 0x6e3   : > { %v1733_v35 = vpop.f32.mrf.mxu1  ;;  %v1741_v36 = vpop.f32.mrf.mxu0 }
 0x6e4   : > { %1372 = vrot.lane.b32.xlu0 %v1364_v34, %s2111_s16 }
 0x6e5   : > { %v1293_v37 = vpop.f32.mrf.mxu1  ;;  %v1366_v39 = vpop.f32.mrf.mxu0 }
 0x6e6   : > { %v1294_v38 = vadd.f32 %v1621_v30, %v1293_v37  ;;  %v1367_v0 = vadd.f32 %v1621_v30, %v1366_v39 }
 0x6e7   : > { %v1734_v40 = vpop.f32.mrf.mxu1  ;;  %v1742_v41 = vpop.f32.mrf.mxu0 }
 0x6e8   : > { %1374 = vrot.lane.b32.xlu1 %v1367_v0, %s2111_s16 }
 0x6e9   : > { %v1428_v42 = vpop.f32.mrf.mxu1 }
 0x6eb   : > { %v1749_v20 = vpop.f32.mrf.mxu1 }
 0x6ed   : > { %v1431_v43 = vpop.f32.mrf.mxu1 }
 0x6ef   : > { %v1750_v44 = vpop.f32.mrf.mxu1 }
 0x756   : > { %v1373_v45 = vpop.permute.xlu0 %1372 }
 0x757   : > { %v1378_v46 = vsel %vm594_vm5, %v1291_v32, %v1373_v45 }
 0x758   : > { %v1429_v47 = vadd.f32 %v1428_v42, %v1378_v46 }
 0x75a   : > { %v1637_v48 = vpack.c.bf16 %v1429_v47, %v1429_v47  ;;  %v1375_v49 = vpop.permute.xlu1 %1374 }
 0x75b   : > { %v1379_v50 = vsel %vm594_vm5, %v1294_v38, %v1375_v49 }
 0x75c   : > { %1444 = vst.msk [vmem:[%s592_s26] sm:$0xf] %vm1443_vm13, %v1637_v48  ;;  %v1432_v51 = vadd.f32 %v1431_v43, %v1379_v50 }
 0x75e   : > { %v1638_v52 = vpack.c.bf16 %v1432_v51, %v1432_v51 }
 0x760   : > { %1445 = vst.msk [vmem:[%s592_s26 + $0x4] sm:$0xf] %vm1443_vm13, %v1638_v52 }
 0x761 PF: > { %s29_s18 = sadd.s32 1, %s2096_s18  }
 0x762   : > { %p26_p2 = scmp.ge.s32.totalorder %s29_s18, 4  }
 0x764   :  { %28 = sbr.rel (!%p26_p2) target bundleno = 6 (0x6), region = 139 }
 0x769   :  { %1467 = vsyncpa [#allocation5], 1 }
 0x76a   :  { %1469 = vsyncpa [#allocation5 + $0x1], 1 }
 0x76b   :  { %1470 = vsyncpa [#allocation7], 1 }
 0x76c   :  { %1471 = vsyncpa [#allocation10], 1 }
 0x76d   :  { %1472 = vsyncpa [#allocation13], 1 }

// kernel: _lambda_.3
= control target key start
LH: loop header
LB: loop body
LE: loop exit
PB: predicated region body
PF: predicated region fallthrough
CT: control target
= control target key end

     0   :  { %s1743_s25 = smov 0   ;;  %s1994_s0 = inlined_call_operand.vmem [shape: bf16[2,32,32], index: 0, kind: input, shape index: {}]   ;;  %s1995_s1 = inlined_call_operand.vmem [shape: bf16[96,32], index: 1, kind: input, shape index: {}]   ;;  %s1996_s2 = inlined_call_operand.vmem [shape: f32[1,32], index: 2, kind: input, shape index: {}]   ;;  %s1997_s3 = inlined_call_operand.vmem [shape: bf16[32,32], index: 3, kind: input, shape index: {}]   ;;  %s1998_s4 = inlined_call_operand.vmem [shape: f32[1,32], index: 4, kind: input, shape index: {}]   ;;  %s1999_s5 = inlined_call_operand.vmem [shape: bf16[96,32], index: 5, kind: input, shape index: {}]   ;;  %s2000_s6 = inlined_call_operand.vmem [shape: f32[1,32], index: 6, kind: input, shape index: {}]   ;;  %s2001_s7 = inlined_call_operand.vmem [shape: bf16[32,32], index: 7, kind: input, shape index: {}]   ;;  %s2002_s8 = inlined_call_operand.vmem [shape: f32[1,32], index: 8, kind: input, shape index: {}]   ;;  %s2003_s9 = inlined_call_operand.vmem [shape: bf16[32,8], index: 9, kind: input, shape index: {}]   ;;  %s2004_s10 = inlined_call_operand.vmem [shape: bf16[32,4], index: 10, kind: input, shape index: {}]   ;;  %s2005_s11 = inlined_call_operand.vmem [shape: bf16[32,4], index: 11, kind: input, shape index: {}]   ;;  %s2006_s12 = inlined_call_operand.vmem [shape: f32[1,4], index: 12, kind: input, shape index: {}]   ;;  %s2007_s13 = inlined_call_operand.vmem [shape: f32[2,32,8], index: 13, kind: output, shape index: {}]  }
   0x1 LB: > { %s1416_s26 = sadd.s32 4294967295, %s1667_s25   ;;  %p1420_p0 = scmp.ge.s32.totalorder %s1667_s25, 1  ;;  %s1667_s25 = sphi %s1743_s25, %s23_s25  }
   0x2   : > { %p387_p1 = scmp.lt.s32.totalorder %s1667_s25, 3 }
   0x4   : > { %p388_p2 = pnand %p1420_p0, %p387_p1 }
   0x5   : > { %p431_p3 = scmp.lt.s32.totalorder (!%p388_p2), %s1416_s26, 1  ;;  %s1670_s22 = smov (!%p388_p2), 32  }
   0x6   : > { %391 = sbr.rel (%p388_p2) target bundleno = 1473 (0x5c1), region = 72  ;;  %s1671_s29 = smov (!%p388_p2), 64  }
   0x7   : > { %s1672_s28 = smov (!%p388_p2), 4  }
   0xb   : > { %vm442_vm0 = vcmask 261120   ;;  %v1669_v0 = vmov 0.0   ;;  %s2009_s26 = smov (!%p431_p3, %s1416_s26), 1  ;;  %v1639_v3 = vld [vmem:[%s1995_s1 + $0x28] sm:$0xff]   ;;  %v1640_v9 = vld [vmem:[%s1995_s1 + $0x20] sm:$0xff]   ;;  %v1641_v11 = vld [vmem:[%s1995_s1 + $0x18] sm:$0xff]  }
   0xc   : > { %447 = vst.msk [vmem:[#allocation2 + $0x20] sm:$0xff] %vm442_vm0, %v1669_v0  ;;  %443 = vst.msk [vmem:[#allocation2] sm:$0xff] %vm442_vm0, %v1669_v0  ;;  %s1468_s27 = sshll.u32 %s2009_s26, 4  ;;  %1515 = vmatprep.subr.bf16.mxu0 %v1639_v3  ;;  %vm477_vm1 = vcmask 1046528   ;;  %vm501_vm2 = vcmask 1045504   ;;  %v1642_v21 = vld [vmem:[%s1995_s1 + $0x10] sm:$0xff]  }
   0xd   : > { %444 = vst.msk [vmem:[#allocation2 + $0x8] sm:$0xff] %vm442_vm0, %v1669_v0  ;;  %445 = vst.msk [vmem:[#allocation2 + $0x10] sm:$0xff] %vm442_vm0, %v1669_v0  ;;  %s435_s30 = scalar_lea.vmem %s1994_s0, %s1468_s27  ;;  %1516 = vmatpush3.bf16.msra.mxu0 %v1639_v3  ;;  %v1643_v35 = vld [vmem:[%s1995_s1 + $0x8] sm:$0xff]   ;;  %v1644_v37 = vld [vmem:[%s1995_s1] sm:$0xff]   ;;  %vm531_vm3 = vcmask 523264   ;;  %vm622_vm5 = vcmask 785408  }
   0xe   : > { %446 = vst.msk [vmem:[#allocation2 + $0x18] sm:$0xff] %vm442_vm0, %v1669_v0  ;;  %448 = vst.msk [vmem:[#allocation2 + $0x28] sm:$0xff] %vm442_vm0, %v1669_v0  ;;  %v1478_v1 = vld [vmem:[%s435_s30 + $0x8] sm:$0xff]   ;;  %v1471_v2 = vld [vmem:[%s435_s30] sm:$0xff]   ;;  %1517 = vmatprep.subr.bf16.mxu0 %v1640_v9  ;;  %vm559_vm4 = vsmask.f32 4352 }
   0xf   : > { %v1477_v4 = vunpack.c.h.bf16 %v1478_v1  ;;  %v1476_v5 = vunpack.c.l.bf16 %v1478_v1  ;;  %v1472_v6 = vunpack.c.l.bf16 %v1471_v2  ;;  %v1473_v7 = vunpack.c.h.bf16 %v1471_v2  ;;  %s1469_s30 = sshll.u32 %s2009_s26, 5 }
  0x10   : > { %vm809_vm6 = vcmask 1043456   ;;  %vm869_vm7 = vcmask 1044480   ;;  %vm1182_vm8 = vsmask.f32 7424  ;;  %vm1286_vm9 = vcmask 31744   ;;  %s440_s16 = scalar_lea.vmem %s2007_s13, %s1469_s30 }
  0x11   : > { %460 = vst.msk [vmem:[#allocation2 + $0x20] sm:$0xff] %vm442_vm0, %v1477_v4  ;;  %457 = vst.msk [vmem:[#allocation2 + $0x8] sm:$0xff] %vm442_vm0, %v1472_v6  ;;  %1518 = vmatpush3.bf16.msra.mxu0 %v1640_v9  ;;  %vm1356_vm10 = vcmask 64512  }
  0x12   : > { %458 = vst.msk [vmem:[#allocation2 + $0x10] sm:$0xff] %vm442_vm0, %v1473_v7  ;;  %459 = vst.msk [vmem:[#allocation2 + $0x18] sm:$0xff] %vm442_vm0, %v1476_v5  ;;  %1519 = vmatprep.subr.bf16.mxu0 %v1641_v11 }
  0x13   : > { %v1823_v43 = vld [vmem:[#allocation2] sm:$0xff] }
  0x14   : > { %v467_v45 = vmax.f32 %v1823_v43, 0.0 }
  0x15   : > { %v1766_v8 = vld [vmem:[#allocation2 + $0x28] sm:$0xff]  ;;  %1520 = vmatpush3.bf16.msra.mxu0 %v1641_v11 }
  0x16   : > { %v472_v10 = vmax.f32 %v1766_v8, 0.0  ;;  %1521 = vmatprep.subr.bf16.mxu0 %v1642_v21 }
  0x18   : > { %v1779_v12 = vld [vmem:[#allocation2 + $0x20] sm:$0xff]  ;;  %v1781_v13 = vld [vmem:[#allocation2 + $0x8] sm:$0xff]  ;;  %v509_v15 = vrot.slane %v472_v10, 2 }
  0x19   : > { %v1783_v14 = vld [vmem:[#allocation2 + $0x10] sm:$0xff]  ;;  %v471_v16 = vmax.f32 %v1779_v12, 0.0  ;;  %v468_v17 = vmax.f32 %v1781_v13, 0.0  ;;  %v1792_v19 = vld [vmem:[#allocation2 + $0x18] sm:$0xff]  ;;  %1522 = vmatpush3.bf16.msra.mxu0 %v1642_v21 }
  0x1a   : > { %v1790_v18 = vmax.f32 %v1783_v14, 0.0  ;;  %v1795_v20 = vmax.f32 %v1792_v19, 0.0  ;;  %1523 = vmatprep.subr.bf16.mxu0 %v1643_v35 }
  0x1b   : > { %v483_v22 = vrot.slane %v471_v16, 1  ;;  %v478_v23 = vrot.slane %v468_v17, 1  ;;  %v502_v25 = vrot.slane %v468_v17, 2  ;;  %v507_v28 = vrot.slane %v471_v16, 2 }
  0x1c   : > { %v479_v24 = vrot.slane %v1790_v18, 1  ;;  %v503_v26 = vrot.slane %v1790_v18, 2  ;;  %v481_v27 = vrot.slane %v1795_v20, 1  ;;  %v505_v29 = vrot.slane %v1795_v20, 2 }
  0x1d   : > { %493 = vrot.lane.b32.xlu1 %v483_v22, %s1670_s22  ;;  %1524 = vmatpush3.bf16.msra.mxu0 %v1643_v35  ;;  %v510_v41 = vsel %vm501_vm2, %v507_v28, %v509_v15  ;;  %v1425_v35 = vld [vmem:[%s1996_s2] ss:$0 sm:$0xff] }
  0x1e   : > { %v480_v30 = vsel %vm477_vm1, %v478_v23, %v479_v24  ;;  %v504_v32 = vsel %vm501_vm2, %v502_v25, %v503_v26  ;;  %v482_v33 = vsel %vm477_vm1, %v479_v24, %v481_v27  ;;  %v484_v34 = vsel %vm477_vm1, %v481_v27, %v483_v22  ;;  %1525 = vmatprep.subr.bf16.mxu0 %v1644_v37 }
  0x1f   : > { %v1599_v31 = vpack.i.bf16 %v480_v30, %v478_v23  ;;  %v1609_v36 = vpack.i.bf16 %v504_v32, %v502_v25  ;;  %v1604_v38 = vpack.i.bf16 %v484_v34, %v482_v33  ;;  %v506_v39 = vsel %vm501_vm2, %v503_v26, %v505_v29  ;;  %v1646_v32 = vld [vmem:[%s1997_s3] sm:$0xff]  }
  0x20   : > { %v508_v40 = vsel %vm501_vm2, %v505_v29, %v507_v28 }
  0x21   : > { %1600 = vrot.lane.b32.xlu0 %v1599_v31, %s1670_s22  ;;  %1610 = vrot.lane.b32.xlu1 %v1609_v36, %s1671_s29  ;;  %v1614_v42 = vpack.i.bf16 %v508_v40, %v506_v39  ;;  %v1645_v31 = vld [vmem:[%s1997_s3 + $0x8] sm:$0xff]  }
  0x22   : > { %1526 = vmatpush3.bf16.msra.mxu0 %v1644_v37  ;;  %1531 = vmatprep.subr.bf16.mxu1 %v1645_v31 }
  0x23   : > { %1532 = vmatpush3.bf16.msra.mxu1 %v1645_v31 }
  0x24   : > { %1533 = vmatprep.subr.bf16.mxu1 %v1646_v32 }
  0x25   : > { %1605 = vrot.lane.b32.xlu0 %v1604_v38, %s1670_s22  ;;  %519 = vrot.lane.b32.xlu1 %v510_v41, %s1671_s29 }
  0x27   : > { %1534 = vmatpush3.bf16.msra.mxu1 %v1646_v32 }
  0x29   : > { %1615 = vrot.lane.b32.xlu0 %v1614_v42, %s1671_s29 }
  0x8f   : > { %v494_v44 = vpop.permute.xlu1 %493 }
  0x90   : > { %v530_v52 = vsel %vm442_vm0, %v471_v16, %v494_v44 }
  0x93   : > { %v1601_v46 = vpop.permute.xlu0 %1600  ;;  %v1611_v49 = vpop.permute.xlu1 %1610 }
  0x94   : > { %v1603_v47 = vunpack.i.h.bf16 %v1601_v46  ;;  %v1602_v48 = vunpack.i.l.bf16 %v1601_v46  ;;  %v1613_v50 = vunpack.i.h.bf16 %v1611_v49  ;;  %v1612_v51 = vunpack.i.l.bf16 %v1611_v49 }
  0x96   : > { %v527_v53 = vsel %vm442_vm0, %v468_v17, %v1603_v47  ;;  %v526_v54 = vsel %vm442_vm0, %v467_v45, %v1602_v48 }
  0x97   : > { %v532_v55 = vsel %vm531_vm3, %v526_v54, %v1612_v51  ;;  %v533_v56 = vsel %vm531_vm3, %v527_v53, %v1613_v50  ;;  %v1606_v57 = vpop.permute.xlu0 %1605  ;;  %v520_v59 = vpop.permute.xlu1 %519  ;;  %v1647_v50 = vld [vmem:[%s1999_s5 + $0x28] sm:$0xff]   ;;  %v1648_v51 = vld [vmem:[%s1999_s5 + $0x20] sm:$0xff]  }
  0x98   : > { %v537_v58 = vpack.c.bf16 %v533_v56, %v532_v55  ;;  %v1608_v60 = vunpack.i.h.bf16 %v1606_v57  ;;  %v1607_v61 = vunpack.i.l.bf16 %v1606_v57  ;;  %v536_v62 = vsel %vm531_vm3, %v530_v52, %v520_v59  ;;  %1539 = vmatprep.subr.bf16.mxu1 %v1647_v50  ;;  %v1434_v52 = vld [vmem:[%s1998_s4] ss:$0 sm:$0xff] }
  0x99   : > { %v539_v63 = vpack.c.bf16 %v536_v62, %v536_v62 }
  0x9a   : > { %v561_v3 = vshrl.u32 %v537_v58, 16  ;;  %v564_v4 = vshll.u32 %v537_v58, 16  ;;  %v529_v5 = vsel %vm442_vm0, %v1795_v20, %v1608_v60  ;;  %v528_v6 = vsel %vm442_vm0, %v1790_v18, %v1607_v61 }
  0x9b   : > { %v1616_v0 = vpop.permute.xlu0 %1615  ;;  %v578_v7 = vshrl.u32 %v539_v63, 16  ;;  %v581_v9 = vshll.u32 %v539_v63, 16 }
  0x9c   : > { %v1618_v1 = vunpack.i.h.bf16 %v1616_v0  ;;  %v1617_v2 = vunpack.i.l.bf16 %v1616_v0  ;;  %v563_v17 = vrot.slane %v561_v3, 3  ;;  %v566_v21 = vrot.slane %v564_v4, 4  ;;  %v1649_v0 = vld [vmem:[%s1999_s5 + $0x18] sm:$0xff]  }
  0x9d   : > { %v580_v22 = vrot.slane %v578_v7, 3  ;;  %v583_v23 = vrot.slane %v581_v9, 4 }
  0x9e   : > { %v534_v11 = vsel %vm531_vm3, %v528_v6, %v1617_v2  ;;  %v535_v15 = vsel %vm531_vm3, %v529_v5, %v1618_v1  ;;  %v567_v28 = vor.u32 %v566_v21, %v563_v17  ;;  %v1651_v6 = vld [vmem:[%s1999_s5 + $0x8] sm:$0xff]  }
  0x9f   : > { %v538_v16 = vpack.c.bf16 %v535_v15, %v534_v11  ;;  %v584_v20 = vor.u32 %v583_v23, %v580_v22  ;;  %v1652_v23 = vld [vmem:[%s1999_s5] sm:$0xff]  }
  0xa1   : > { %v569_v24 = vshrl.u32 %v538_v16, 16  ;;  %v572_v25 = vshll.u32 %v538_v16, 16 }
  0xa3   : > { %v571_v26 = vrot.slane %v569_v24, 3  ;;  %v574_v27 = vrot.slane %v572_v25, 4 }
  0xa5   : > { %v575_v29 = vor.u32 %v574_v27, %v571_v26 }
  0xa7   : > { %v576_v18 = vsel %vm559_vm4, %v567_v28, %v575_v29  ;;  %v585_v30 = vsel %vm559_vm4, %v575_v29, %v584_v20 }
  0xa8   : > { %1527 = vmatprep.mubr.msk.bf16.mxu0 %vm622_vm5, %v576_v18 }
  0xa9   : > { %1528 = vmatmul.mubr.msk.bf16.vlgmr.msra.gmra.mxu0 %vm622_vm5, %v585_v30 }
 0x169   : > { %v1529_v33 = vpop.f32.mrf.mxu0 }
 0x16a   : > { %v672_v39 = vadd.f32 %v1529_v33, %v1425_v35  ;;  %v817_v33 = vrot.slane %v472_v10, 4 }
 0x16b   : > { %v663_v34 = vpop.f32.mrf.mxu0 }
 0x16c   : > { %v664_v37 = vadd.f32 %v1425_v35, %v663_v34  ;;  %v680_v47 = vmax.f32 %v672_v39, 0.0 }
 0x16d   : > { %v1530_v36 = vpop.f32.mrf.mxu0 }
 0x16e   : > { %v675_v38 = vadd.f32 %v1530_v36, %v1425_v35  ;;  %v678_v44 = vmax.f32 %v664_v37, 0.0 }
 0x16f   : > { %v666_v40 = vpop.f32.mrf.mxu0 }
 0x170   : > { %v667_v41 = vadd.f32 %v1425_v35, %v666_v40  ;;  %v681_v42 = vmax.f32 %v675_v38, 0.0 }
 0x172   : > { %v679_v46 = vmax.f32 %v667_v41, 0.0  ;;  %v683_v49 = vpack.c.bf16 %v681_v42, %v680_v47 }
 0x174   : > { %v682_v48 = vpack.c.bf16 %v679_v46, %v678_v44 }
 0x176   : > { %1535 = vmatprep.mubr.msk.bf16.mxu1 %vm442_vm0, %v682_v48 }
 0x177   : > { %1536 = vmatmul.mubr.msk.bf16.vlgmr.msra.gmra.mxu1 %vm442_vm0, %v683_v49 }
 0x178   : > { %1540 = vmatpush3.bf16.msra.mxu1 %v1647_v50 }
 0x179   : > { %1541 = vmatprep.subr.bf16.mxu1 %v1648_v51 }
 0x17c   : > { %1542 = vmatpush3.bf16.msra.mxu1 %v1648_v51 }
 0x17d   : > { %1543 = vmatprep.subr.bf16.mxu1 %v1649_v0 }
 0x180   : > { %1544 = vmatpush3.bf16.msra.mxu1 %v1649_v0 }
 0x237   : > { %v1537_v53 = vpop.f32.mrf.mxu1 }
 0x238   : > { %v756_v54 = vadd.f32 %v1537_v53, %v1434_v52 }
 0x239   : > { %v747_v55 = vpop.f32.mrf.mxu1 }
 0x23a   : > { %v764_v56 = vadd.f32 %v756_v54, %v1792_v19  ;;  %v748_v57 = vadd.f32 %v1434_v52, %v747_v55 }
 0x23b   : > { %v1538_v58 = vpop.f32.mrf.mxu1 }
 0x23c   : > { %768 = vst.msk [vmem:[#allocation2 + $0x18] sm:$0xff] %vm442_vm0, %v764_v56  ;;  %v762_v59 = vadd.f32 %v748_v57, %v1781_v13  ;;  %v759_v60 = vadd.f32 %v1538_v58, %v1434_v52 }
 0x23d   : > { %v750_v61 = vpop.f32.mrf.mxu1 }
 0x23e   : > { %766 = vst.msk [vmem:[#allocation2 + $0x8] sm:$0xff] %vm442_vm0, %v762_v59  ;;  %v765_v62 = vadd.f32 %v759_v60, %v1779_v12  ;;  %v751_v63 = vadd.f32 %v1434_v52, %v750_v61  ;;  %v1650_v12 = vld [vmem:[%s1999_s5 + $0x10] sm:$0xff]  }
 0x23f   : > { %1545 = vmatprep.subr.bf16.mxu1 %v1650_v12 }
 0x240   : > { %769 = vst.msk [vmem:[#allocation2 + $0x20] sm:$0xff] %vm442_vm0, %v765_v62  ;;  %v763_v19 = vadd.f32 %v751_v63, %v1783_v14  ;;  %1546 = vmatpush3.bf16.msra.mxu1 %v1650_v12 }
 0x241   : > { %1547 = vmatprep.subr.bf16.mxu1 %v1651_v6 }
 0x242   : > { %767 = vst.msk [vmem:[#allocation2 + $0x10] sm:$0xff] %vm442_vm0, %v763_v19 }
 0x243   : > { %v1875_v13 = vld [vmem:[#allocation2 + $0x18] sm:$0xff] }
 0x244   : > { %v779_v4 = vmax.f32 %v1875_v13, 0.0  ;;  %1548 = vmatpush3.bf16.msra.mxu1 %v1651_v6 }
 0x245   : > { %v1877_v1 = vld [vmem:[#allocation2 + $0x8] sm:$0xff]  ;;  %1549 = vmatprep.subr.bf16.mxu1 %v1652_v23 }
 0x246   : > { %v777_v14 = vmax.f32 %v1877_v1, 0.0  ;;  %v789_v15 = vrot.slane %v779_v4, 2  ;;  %v813_v22 = vrot.slane %v779_v4, 4 }
 0x247   : > { %v1882_v2 = vld [vmem:[#allocation2 + $0x20] sm:$0xff] }
 0x248   : > { %v780_v3 = vmax.f32 %v1882_v2, 0.0  ;;  %v786_v16 = vrot.slane %v777_v14, 2  ;;  %v810_v21 = vrot.slane %v777_v14, 4  ;;  %1550 = vmatpush3.bf16.msra.mxu1 %v1652_v23 }
 0x249   : > { %v1887_v5 = vld [vmem:[#allocation2 + $0x10] sm:$0xff] }
 0x24a   : > { %v791_v7 = vrot.slane %v780_v3, 2  ;;  %v778_v9 = vmax.f32 %v1887_v5, 0.0  ;;  %v815_v27 = vrot.slane %v780_v3, 4 }
 0x24c   : > { %801 = vrot.lane.b32.xlu0 %v791_v7, %s1670_s22  ;;  %v787_v11 = vrot.slane %v778_v9, 2  ;;  %v811_v17 = vrot.slane %v778_v9, 4  ;;  %v792_v25 = vsel %vm501_vm2, %v789_v15, %v791_v7  ;;  %v816_v30 = vsel %vm809_vm6, %v813_v22, %v815_v27  ;;  %v1439_v7 = vld [vmem:[%s2000_s6] ss:$0 sm:$0xff] }
 0x24d   : > { %v818_v34 = vsel %vm809_vm6, %v815_v27, %v817_v33 }
 0x24e   : > { %v790_v24 = vsel %vm501_vm2, %v787_v11, %v789_v15  ;;  %v788_v26 = vsel %vm501_vm2, %v786_v16, %v787_v11  ;;  %v812_v29 = vsel %vm809_vm6, %v810_v21, %v811_v17  ;;  %v814_v18 = vsel %vm809_vm6, %v811_v17, %v813_v22 }
 0x24f   : > { %v1624_v20 = vpack.i.bf16 %v792_v25, %v790_v24  ;;  %v1619_v28 = vpack.i.bf16 %v788_v26, %v786_v16  ;;  %v1629_v31 = vpack.i.bf16 %v812_v29, %v810_v21  ;;  %v1634_v32 = vpack.i.bf16 %v816_v30, %v814_v18  ;;  %v1657_v29 = vld [vmem:[%s2005_s11] sm:$0xff]   ;;  %v1947_v30 = vld [vmem:[%s2003_s9 + $0x8] sm:$0xff]  }
 0x250   : > { %v1658_v18 = vld [vmem:[%s2004_s10] sm:$0xff]  }
 0x251   : > { %1625 = vrot.lane.b32.xlu1 %v1624_v20, %s1670_s22  ;;  %1620 = vrot.lane.b32.xlu0 %v1619_v28, %s1670_s22  ;;  %v1655_v20 = vld [vmem:[%s2005_s11 + $0x8] sm:$0xff]  }
 0x252   : > { %v1656_v28 = vld [vmem:[%s2004_s10 + $0x8] sm:$0xff]   ;;  %1571 = vmatprep.subr.bf16.mxu1 %v1655_v20 }
 0x255   : > { %1630 = vrot.lane.b32.xlu1 %v1629_v31, %s1671_s29  ;;  %1635 = vrot.lane.b32.xlu0 %v1634_v32, %s1671_s29  ;;  %v1448_v31 = vld [vmem:[%s2002_s8] ss:$0 sm:$0xff] }
 0x259   : > { %827 = vrot.lane.b32.xlu1 %v818_v34, %s1671_s29 }
 0x2be   : > { %v802_v35 = vpop.permute.xlu0 %801 }
 0x2bf   : > { %v838_v57 = vsel %vm442_vm0, %v780_v3, %v802_v35  ;;  %v1653_v3 = vld [vmem:[%s2001_s7 + $0x8] sm:$0xff]  }
 0x2c0   : > { %1555 = vmatprep.subr.bf16.mxu0 %v1653_v3 }
 0x2c1   : > { %1556 = vmatpush3.bf16.msra.mxu0 %v1653_v3 }
 0x2c3   : > { %v1626_v36 = vpop.permute.xlu1 %1625  ;;  %v1621_v37 = vpop.permute.xlu0 %1620 }
 0x2c4   : > { %v1628_v38 = vunpack.i.h.bf16 %v1626_v36  ;;  %v1627_v39 = vunpack.i.l.bf16 %v1626_v36  ;;  %v1623_v40 = vunpack.i.h.bf16 %v1621_v37  ;;  %v1622_v41 = vunpack.i.l.bf16 %v1621_v37 }
 0x2c6   : > { %v837_v49 = vsel %vm442_vm0, %v779_v4, %v1628_v38  ;;  %v836_v50 = vsel %vm442_vm0, %v778_v9, %v1627_v39  ;;  %v835_v51 = vsel %vm442_vm0, %v777_v14, %v1623_v40  ;;  %v834_v52 = vsel %vm442_vm0, %v467_v45, %v1622_v41  ;;  %v1654_v4 = vld [vmem:[%s2001_s7] sm:$0xff]  }
 0x2c7   : > { %v1631_v42 = vpop.permute.xlu1 %1630  ;;  %v1636_v44 = vpop.permute.xlu0 %1635  ;;  %1557 = vmatprep.subr.bf16.mxu0 %v1654_v4 }
 0x2c8   : > { %v1633_v46 = vunpack.i.h.bf16 %v1631_v42  ;;  %v1632_v47 = vunpack.i.l.bf16 %v1631_v42  ;;  %v1638_v48 = vunpack.i.h.bf16 %v1636_v44  ;;  %v1637_v10 = vunpack.i.l.bf16 %v1636_v44  ;;  %1558 = vmatpush3.bf16.msra.mxu0 %v1654_v4 }
 0x2c9   : > { %1563 = vmatprep.subr.bf16.mxu0 %v1656_v28 }
 0x2ca   : > { %v839_v53 = vsel %vm531_vm3, %v834_v52, %v1632_v47  ;;  %v840_v54 = vsel %vm531_vm3, %v835_v51, %v1633_v46  ;;  %v842_v55 = vsel %vm531_vm3, %v837_v49, %v1638_v48  ;;  %v841_v56 = vsel %vm531_vm3, %v836_v50, %v1637_v10 }
 0x2cb   : > { %v844_v58 = vpack.c.bf16 %v840_v54, %v839_v53  ;;  %v845_v59 = vpack.c.bf16 %v842_v55, %v841_v56  ;;  %v828_v60 = vpop.permute.xlu1 %827 }
 0x2cc   : > { %v843_v61 = vsel %vm531_vm3, %v838_v57, %v828_v60 }
 0x2cd   : > { %v870_v62 = vrot.slane %v844_v58, 3  ;;  %v871_v63 = vrot.slane %v845_v59, 3  ;;  %v846_v0 = vpack.c.bf16 %v843_v61, %v843_v61 }
 0x2cf   : > { %v873_v45 = vrot.slane %v846_v0, 3  ;;  %v872_v19 = vsel %vm869_vm7, %v870_v62, %v871_v63 }
 0x2d0   : > { %1551 = vmatprep.mubr.msk.bf16.mxu1 %vm622_vm5, %v872_v19 }
 0x2d1   : > { %v874_v12 = vsel %vm869_vm7, %v871_v63, %v873_v45 }
 0x2d2   : > { %1552 = vmatmul.mubr.msk.bf16.vlgmr.msra.gmra.mxu1 %vm622_vm5, %v874_v12 }
 0x2d3   : > { %1572 = vmatpush3.bf16.msra.mxu1 %v1655_v20 }
 0x2d4   : > { %1573 = vmatprep.subr.bf16.mxu1 %v1657_v29 }
 0x2d7   : > { %1574 = vmatpush3.bf16.msra.mxu1 %v1657_v29 }
 0x392   : > { %v1553_v14 = vpop.f32.mrf.mxu1 }
 0x393   : > { %v960_v16 = vadd.f32 %v1553_v14, %v1439_v7 }
 0x394   : > { %v951_v6 = vpop.f32.mrf.mxu1 }
 0x395   : > { %v952_v11 = vadd.f32 %v1439_v7, %v951_v6  ;;  %v968_v25 = vmax.f32 %v960_v16, 0.0  ;;  %v1660_v16 = vld [vmem:[%s2003_s9] sm:$0xff]  }
 0x396   : > { %v1554_v9 = vpop.f32.mrf.mxu1 }
 0x397   : > { %v963_v15 = vadd.f32 %v1554_v9, %v1439_v7  ;;  %v966_v23 = vmax.f32 %v952_v11, 0.0 }
 0x398   : > { %v954_v17 = vpop.f32.mrf.mxu1 }
 0x399   : > { %v955_v21 = vadd.f32 %v1439_v7, %v954_v17  ;;  %v969_v22 = vmax.f32 %v963_v15, 0.0 }
 0x39b   : > { %v967_v24 = vmax.f32 %v955_v21, 0.0  ;;  %v971_v27 = vpack.c.bf16 %v969_v22, %v968_v25 }
 0x39d   : > { %v970_v26 = vpack.c.bf16 %v967_v24, %v966_v23  ;;  %v1453_v23 = vld [vmem:[%s2006_s12] ss:$0 sm:$0xff] }
 0x39f   : > { %1559 = vmatprep.mubr.msk.bf16.mxu0 %vm442_vm0, %v970_v26 }
 0x3a0   : > { %1560 = vmatmul.mubr.msk.bf16.vlgmr.msra.gmra.mxu0 %vm442_vm0, %v971_v27 }
 0x3a1   : > { %1564 = vmatpush3.bf16.msra.mxu0 %v1656_v28 }
 0x3a2   : > { %1565 = vmatprep.subr.bf16.mxu0 %v1658_v18 }
 0x3a5   : > { %1566 = vmatpush3.bf16.msra.mxu0 %v1658_v18 }
 0x3a6   : > { %1579 = vmatprep.subr.bf16.mxu0 %v1947_v30 }
 0x460   : > { %v1561_v32 = vpop.f32.mrf.mxu0 }
 0x461   : > { %v1044_v33 = vadd.f32 %v1561_v32, %v1448_v31 }
 0x462   : > { %v1035_v34 = vpop.f32.mrf.mxu0 }
 0x463   : > { %v1052_v35 = vadd.f32 %v1044_v33, %v1875_v13  ;;  %v1036_v36 = vadd.f32 %v1448_v31, %v1035_v34 }
 0x464   : > { %v1562_v37 = vpop.f32.mrf.mxu0 }
 0x465   : > { %1056 = vst.msk [vmem:[#allocation2 + $0x18] sm:$0xff] %vm442_vm0, %v1052_v35  ;;  %v1050_v38 = vadd.f32 %v1036_v36, %v1877_v1  ;;  %v1047_v39 = vadd.f32 %v1562_v37, %v1448_v31  ;;  %v1069_v1 = vpack.c.bf16 %v1766_v8, %v1766_v8 }
 0x466   : > { %v1038_v40 = vpop.f32.mrf.mxu0 }
 0x467   : > { %1054 = vst.msk [vmem:[#allocation2 + $0x8] sm:$0xff] %vm442_vm0, %v1050_v38  ;;  %v1053_v41 = vadd.f32 %v1047_v39, %v1882_v2  ;;  %v1039_v42 = vadd.f32 %v1448_v31, %v1038_v40  ;;  %v1199_v56 = vshll.u32 %v1069_v1, 16 }
 0x469   : > { %1057 = vst.msk [vmem:[#allocation2 + $0x20] sm:$0xff] %vm442_vm0, %v1053_v41  ;;  %v1051_v44 = vadd.f32 %v1039_v42, %v1887_v5  ;;  %v1201_v3 = vrot.slane %v1199_v56, 1 }
 0x46b   : > { %1055 = vst.msk [vmem:[#allocation2 + $0x10] sm:$0xff] %vm442_vm0, %v1051_v44 }
 0x46c   : > { %v1061_v47 = vld [vmem:[#allocation2 + $0x18] sm:$0xff] }
 0x46e   : > { %v1059_v13 = vld [vmem:[#allocation2 + $0x8] sm:$0xff] }
 0x46f   : > { %v1064_v46 = vpack.c.bf16 %v1059_v13, %v1823_v43 }
 0x470   : > { %v1062_v48 = vld [vmem:[#allocation2 + $0x20] sm:$0xff] }
 0x471   : > { %v1086_v10 = vshrl.u32 %v1064_v46, 16  ;;  %v1089_v49 = vshll.u32 %v1064_v46, 16  ;;  %v1068_v50 = vpack.c.bf16 %v1062_v48, %v1061_v47  ;;  %v1066_v51 = vpack.c.bf16 %v1062_v48, %v1062_v48 }
 0x472   : > { %v1060_v2 = vld [vmem:[#allocation2 + $0x10] sm:$0xff] }
 0x473   : > { %v1065_v52 = vpack.c.bf16 %v1061_v47, %v1060_v2  ;;  %v1067_v53 = vpack.c.bf16 %v1060_v2, %v1059_v13  ;;  %v1191_v54 = vshll.u32 %v1068_v50, 16  ;;  %v1103_v55 = vshrl.u32 %v1066_v51, 16 }
 0x474   : > { %v1106_v5 = vshll.u32 %v1066_v51, 16  ;;  %v1088_v57 = vrot.slane %v1086_v10, 3  ;;  %v1091_v58 = vrot.slane %v1089_v49, 4  ;;  %v1195_v45 = vshrl.u32 %v1068_v50, 16 }
 0x475   : > { %v1094_v59 = vshrl.u32 %v1065_v52, 16  ;;  %v1097_v43 = vshll.u32 %v1065_v52, 16  ;;  %v1186_v60 = vshll.u32 %v1067_v53, 16  ;;  %v1193_v61 = vrot.slane %v1191_v54, 1 }
 0x476   : > { %v1105_v62 = vrot.slane %v1103_v55, 3  ;;  %v1108_v63 = vrot.slane %v1106_v5, 4  ;;  %v1184_v19 = vshrl.u32 %v1067_v53, 16  ;;  %v1092_v4 = vor.u32 %v1091_v58, %v1088_v57 }
 0x477   : > { %v1096_v8 = vrot.slane %v1094_v59, 3  ;;  %v1099_v0 = vrot.slane %v1097_v43, 4  ;;  %v1188_v12 = vrot.slane %v1186_v60, 1  ;;  %v1197_v6 = vor.u32 %v1195_v45, %v1193_v61 }
 0x478   : > { %v1109_v7 = vor.u32 %v1108_v63, %v1105_v62 }
 0x479   : > { %v1100_v14 = vor.u32 %v1099_v0, %v1096_v8  ;;  %v1189_v9 = vor.u32 %v1188_v12, %v1184_v19  ;;  %v1202_v21 = vsel %vm1182_vm8, %v1197_v6, %v1201_v3 }
 0x47b   : > { %v1101_v11 = vsel %vm559_vm4, %v1092_v4, %v1100_v14  ;;  %v1110_v15 = vsel %vm559_vm4, %v1100_v14, %v1109_v7  ;;  %v1194_v17 = vsel %vm1182_vm8, %v1189_v9, %v1193_v61 }
 0x47c   : > { %1567 = vmatprep.mubr.msk.bf16.mxu0 %vm442_vm0, %v1101_v11  ;;  %1575 = vmatprep.mubr.msk.bf16.mxu1 %vm442_vm0, %v1194_v17 }
 0x47d   : > { %1568 = vmatmul.mubr.msk.bf16.vlgmr.msra.gmra.mxu0 %vm442_vm0, %v1110_v15  ;;  %1576 = vmatmul.mubr.msk.bf16.vlgmr.msra.gmra.mxu1 %vm442_vm0, %v1202_v21 }
 0x47e   : > { %1580 = vmatpush3.bf16.msra.mxu0 %v1947_v30  ;;  %1583 = vmatprep.mubr.msk.bf16.mxu0 %vm442_vm0, %v1067_v53 }
 0x47f   : > { %1581 = vmatprep.subr.bf16.mxu0 %v1660_v16 }
 0x482   : > { %1582 = vmatpush3.bf16.msra.mxu0 %v1660_v16 }
 0x485   : > { %1584 = vmatmul.mubr.msk.bf16.vlgmr.msra.gmra.mxu0 %vm442_vm0, %v1068_v50 }
 0x53d   : > { %v1577_v22 = vpop.f32.mrf.mxu1  ;;  %v1569_v18 = vpop.f32.mrf.mxu0 }
 0x53e   : > { %v1264_v20 = vadd.f32 %v1577_v22, %v1453_v23  ;;  %v1172_v40 = vadd.f32 %v1569_v18, %v1453_v23 }
 0x53f   : > { %v1255_v24 = vpop.f32.mrf.mxu1  ;;  %v1163_v30 = vpop.f32.mrf.mxu0 }
 0x540   : > { %v1256_v25 = vadd.f32 %v1453_v23, %v1255_v24  ;;  %v1164_v35 = vadd.f32 %v1453_v23, %v1163_v30 }
 0x541   : > { %v1578_v26 = vpop.f32.mrf.mxu1  ;;  %v1570_v31 = vpop.f32.mrf.mxu0 }
 0x542   : > { %1274 = vrot.lane.b32.xlu0 %v1256_v25, %s1672_s28  ;;  %v1267_v29 = vadd.f32 %v1578_v26, %v1453_v23  ;;  %v1175_v10 = vadd.f32 %v1570_v31, %v1453_v23 }
 0x543   : > { %v1258_v27 = vpop.f32.mrf.mxu1  ;;  %v1166_v32 = vpop.f32.mrf.mxu0 }
 0x544   : > { %v1259_v28 = vadd.f32 %v1453_v23, %v1258_v27  ;;  %v1167_v41 = vadd.f32 %v1453_v23, %v1166_v32 }
 0x545   : > { %v1585_v33 = vpop.f32.mrf.mxu0 }
 0x546   : > { %1276 = vrot.lane.b32.xlu1 %v1259_v28, %s1672_s28  ;;  %1278 = vrot.lane.b32.xlu0 %v1264_v20, %s1672_s28 }
 0x547   : > { %v1341_v34 = vpop.f32.mrf.mxu0 }
 0x549   : > { %v1586_v37 = vpop.f32.mrf.mxu0 }
 0x54a   : > { %1280 = vrot.lane.b32.xlu1 %v1267_v29, %s1672_s28 }
 0x54b   : > { %v1344_v13 = vpop.f32.mrf.mxu0 }
 0x5b4   : > { %v1275_v36 = vpop.permute.xlu0 %1274 }
 0x5b5   : > { %v1287_v38 = vsel %vm1286_vm9, %v1164_v35, %v1275_v36 }
 0x5b6   : > { %v1342_v39 = vadd.f32 %v1341_v34, %v1287_v38 }
 0x5b8   : > { %1357 = vst.msk [vmem:[%s440_s16] sm:$0xff] %vm1356_vm10, %v1342_v39  ;;  %v1277_v42 = vpop.permute.xlu1 %1276  ;;  %v1279_v44 = vpop.permute.xlu0 %1278 }
 0x5b9   : > { %v1288_v46 = vsel %vm1286_vm9, %v1167_v41, %v1277_v42  ;;  %v1289_v47 = vsel %vm1286_vm9, %v1172_v40, %v1279_v44 }
 0x5ba   : > { %v1345_v48 = vadd.f32 %v1344_v13, %v1288_v46  ;;  %v1350_v1 = vadd.f32 %v1585_v33, %v1289_v47 }
 0x5bc   : > { %1358 = vst.msk [vmem:[%s440_s16 + $0x8] sm:$0xff] %vm1356_vm10, %v1345_v48  ;;  %1359 = vst.msk [vmem:[%s440_s16 + $0x10] sm:$0xff] %vm1356_vm10, %v1350_v1  ;;  %v1281_v49 = vpop.permute.xlu1 %1280 }
 0x5bd   : > { %v1290_v50 = vsel %vm1286_vm9, %v1175_v10, %v1281_v49 }
 0x5be   : > { %v1353_v51 = vadd.f32 %v1586_v37, %v1290_v50 }
 0x5c0   : > { %1360 = vst.msk [vmem:[%s440_s16 + $0x18] sm:$0xff] %vm1356_vm10, %v1353_v51 }
 0x5c1 PF: > { %s23_s25 = sadd.s32 1, %s1667_s25  }
 0x5c2   : > { %p20_p4 = scmp.ge.s32.totalorder %s23_s25, 4  }
 0x5c4   :  { %22 = sbr.rel (!%p20_p4) target bundleno = 1 (0x1), region = 102 }

</bundles_post_ra>
